<compile_context>
chip_gen: v5e
topology: v5e:2x2
jax: 0.10.0
libtpu: 0.0.40
codegen_flags: <defaults>
</compile_context>

<pallas_src>
import math

import jax
import jax.numpy as jnp
import numpy as np
from jax import lax
from jax.experimental import pallas as pl
from jax.experimental.pallas import tpu as pltpu

# ----------------------------- configuration --------------------------------
B = 2                   # batch
STATE_DIM = 12          # InitDict['state_dim']
ACTION_DIM = 4          # InitDict['action_dim']
N_EMBD = 32             # InitDict['embeddingT'] (mid_dim)
N_HEAD = 4              # InitDict['atthead']
HEAD_DIM = N_EMBD // N_HEAD
N_LAYER = 1             # InitDict['attlayer']
N_BLOCKS = 2 * N_LAYER  # BlockSeq builds 2*n_layer BlockGTrXL layers (use_TS=False)
BLOCK_SIZE = 8          # InitDict['block_size'] -> T_k of past_state
T_Q = 1                 # forward() reshapes state to (B, 1, state_dim)
INIT_GRU_GATE_BIAS = 2.0
LN_EPS = 1e-5

_F32 = jnp.float32

# packed activation-slab row layout (32 rows x 16 cols):
#   rows 0:B        state (query)              cols 0:STATE_DIM
#   rows B:8        zero padding (tile aligned)
#   rows 8:24       past_state flattened (k/v) cols 0:STATE_DIM
#   rows 24:32      att_bias[0] augmented      cols 0:STATE_DIM, col STATE_DIM == 1
_XROWS = 32
_XCOLS = 16
_KV0 = 8
_AB0 = 24
_OUT_LANES = 128

# global parameter slab (g) row layout, 128 lanes wide
_G_EMBW = 0      # 0:16   embedding weight; biasS weight/bias in lane column E
_G_ADD = 16      # 16:48  additive embedding rows (tok_b + pos), zero elsewhere
_G_WKV = 48      # 48:80  [K0|V0|K1|V1] projection weights (ln1 affine folded)
_G_BKV = 80      # row    matching bias
_G_BA1 = 81      # row    act_b1' (lnf folded), cols 0:E
_G_BA2 = 82      # row    act_b2 (lane padded)
_G_HSUM = 88     # 88:120 cols 0:E head-sum matrix (pre-scaled) ; cols E:2E act_w1'
_G_AW2 = 120     # 120:152 act_w2 lane-padded to 128
_G_ROWS = 152

# per-layer weight slab (w) row layout, 128 lanes wide
_W_QM = 0        # 0:32   cols 0:E wq' ; cols E:3E mlp_w1' ; cols 3E:4E uh1
_W_G1 = 32       # 32:96  cols 0:3E fused gate1 weight ; rows 32:64 cols 3E:4E uh2
_W_G2 = 96       # 96:192 cols 0:3E fused gate2 weight
_W_BQ = 192      # row    cols 0:E bq' ; cols E:3E mlp_b1'
_W_BG1 = 193     # row    cols 0:3E gate1 bias (z-slice already has -bz folded in)
_W_BG2 = 194     # row    cols 0:3E gate2 bias
_W_ROWS = 200


# --------------------------- shared math helpers -----------------------------
def _erf_approx(x):
    # Abramowitz & Stegun 7.1.26, |error| < 1.5e-7 (~f32 eps).
    # TODO(synk): PyTorch nn.GELU() uses exact erf; Pallas/Mosaic has no erf
    # primitive, so this (effectively exact in f32) polynomial is used instead.
    a1, a2, a3, a4, a5 = 0.254829592, -0.284496736, 1.421413741, -1.453152027, 1.061405429
    p = 0.3275911
    sgn = jnp.where(x < 0, -1.0, 1.0)
    ax = jnp.abs(x)
    t = 1.0 / (1.0 + p * ax)
    poly = ((((a5 * t + a4) * t + a3) * t + a2) * t + a1) * t
    return sgn * (1.0 - poly * jnp.exp(-ax * ax))


def gelu(x):
    return 0.5 * x * (1.0 + _erf_approx(x * 0.7071067811865476))


def _sigmoid(x):
    # sigmoid(x) == 0.5*(1 + tanh(x/2)): single EUP transcendental (free slot).
    return 0.5 * (jnp.tanh(0.5 * x) + 1.0)


# ------------------------------ Pallas kernel --------------------------------
def _actor_ppo_att_kernel(x_ref, g_ref, w_ref, out_ref):
    # x_ref   (32, 16)         activation slab (layout above)
    # g_ref   (152, 128)       global params: embedding, KV proj (all layers), head
    # w_ref   (L, 200, 128)    per-layer folded/fused weights + bias rows
    # out_ref (B, 128)         lane-dense output; wrapper slices to ACTION_DIM
    E = N_EMBD
    Tk = BLOCK_SIZE

    def dot(a, b):
        return jnp.dot(a, b, preferred_element_type=_F32)

    def normalize(x):
        # raw LayerNorm statistics; every affine is folded into downstream weights
        mu = jnp.mean(x, axis=-1, keepdims=True)
        xc = x - mu
        var = jnp.mean(xc * xc, axis=-1, keepdims=True)
        return xc * lax.rsqrt(var + LN_EPS)

    # ---- fused token embedding + spatial-bias Linear: one (32,16)@(16,128) matmul
    emb = dot(x_ref[...], g_ref[_G_EMBW:_G_EMBW + 16, :]) + g_ref[_G_ADD:_G_ADD + 32, :]
    q2 = emb[0:B, 0:E]                       # (B, E)   query embeddings
    kv2 = emb[_KV0:_AB0, 0:E]                # (B*Tk, E) key/value embeddings
    bias_col = emb[_AB0:_XROWS, E:E + 1]     # (Tk, 1)  biasS(att_bias) per k position

    # ---- K/V for ALL layers at once (layer-invariant: k/v stay the raw embeddings)
    kv_raw = normalize(kv2)
    kv_all = dot(kv_raw, g_ref[_G_WKV:_G_WKV + E, :]) + g_ref[_G_BKV:_G_BKV + 1, :]  # (16,128)

    # block-diagonal head-sum matrix, pre-scaled by 1/sqrt(hd) at pack time
    head_sum = g_ref[_G_HSUM:_G_HSUM + E, 0:E]                                       # (E, E)

    # ---- 2 * n_layer BlockGTrXL layers -------------------------------------
    for l in range(N_BLOCKS):
        wq = w_ref[l, _W_QM:_W_QM + E, 0:E]
        wm1 = w_ref[l, _W_QM:_W_QM + E, E:3 * E]
        uh1 = w_ref[l, _W_QM:_W_QM + E, 3 * E:4 * E]
        wg1 = w_ref[l, _W_G1:_W_G1 + 2 * E, 0:3 * E]
        uh2 = w_ref[l, _W_G1:_W_G1 + E, 3 * E:4 * E]
        wg2 = w_ref[l, _W_G2:_W_G2 + 3 * E, 0:3 * E]
        bq = w_ref[l, _W_BQ:_W_BQ + 1, 0:E]
        bm1 = w_ref[l, _W_BQ:_W_BQ + 1, E:3 * E]
        bg1 = w_ref[l, _W_BG1:_W_BG1 + 1, 0:3 * E]
        bg2 = w_ref[l, _W_BG2:_W_BG2 + 1, 0:3 * E]

        # Q projection, ln1 affine folded into wq/bq
        q_a = dot(normalize(q2), wq) + bq                                 # (B, E)
        k3 = kv_all[:, 2 * E * l:2 * E * l + E].reshape(B, Tk, E)
        v3 = kv_all[:, 2 * E * l + E:2 * E * l + 2 * E].reshape(B, Tk, E)

        # all heads at once: broadcast q*k, block-diag head-sum matmul (scale folded),
        # one softmax over T_k, one weighted value reduction
        prod = q_a[:, None, :] * k3                                       # (B, Tk, E)
        sc = dot(prod.reshape(B * Tk, E), head_sum).reshape(B, Tk, E)
        sc = sc + bias_col[None]                                          # attn_bias per k pos
        m = jnp.max(sc, axis=1, keepdims=True)
        p = jnp.exp(sc - m)
        denom = jnp.sum(p, axis=1, keepdims=True)
        p = p * pl.reciprocal(denom, approx=True)                         # EUP reciprocal
        y2 = jnp.sum(p * v3, axis=1)                                      # (B, E)

        # GRU gate 1: proj (wp,bp) folded into x-side weights; x/h matmuls fused
        # via row-stacked weight so the x+h adds happen inside the MXU
        g1 = dot(jnp.concatenate([y2, q2], axis=1), wg1) + bg1            # (B, 3E)
        r1 = _sigmoid(g1[:, 0:E])
        z1 = _sigmoid(g1[:, E:2 * E])                                     # -bz folded into bg1
        hn1 = jnp.tanh(g1[:, 2 * E:3 * E] + dot(q2 * r1, uh1))
        x = (1.0 - z1) * q2 + z1 * hn1

        # MLP up-projection, ln2 affine folded into mlp_w1/mlp_b1
        h1 = gelu(dot(normalize(x), wm1) + bm1)                           # (B, 2E)

        # GRU gate 2: mlp_w2/mlp_b2 folded into x-side weights; fused stacked matmul
        g2 = dot(jnp.concatenate([h1, x], axis=1), wg2) + bg2             # (B, 3E)
        r2 = _sigmoid(g2[:, 0:E])
        z2 = _sigmoid(g2[:, E:2 * E])
        hn2 = jnp.tanh(g2[:, 2 * E:3 * E] + dot(x * r2, uh2))
        q2 = (1.0 - z2) * x + z2 * hn2

    # ---- final LayerNorm (affine folded into act_w1/act_b1) + netaction head
    a1 = gelu(dot(normalize(q2), g_ref[_G_HSUM:_G_HSUM + E, E:2 * E])
              + g_ref[_G_BA1:_G_BA1 + 1, 0:E])
    out_ref[...] = jnp.tanh(dot(a1, g_ref[_G_AW2:_G_AW2 + E, :])
                            + g_ref[_G_BA2:_G_BA2 + 1, :])                # (B, 128)


# --------------------------- parameter construction --------------------------
def init_params(key):
    keys = iter(jax.random.split(key, 256))

    def nrm(shape, std=0.02):
        return jax.random.normal(next(keys), shape, _F32) * std

    E, S, A = N_EMBD, STATE_DIM, ACTION_DIM
    p = {
        'tok_w': nrm((S, E)), 'tok_b': jnp.zeros((E,), _F32),
        'pos_emb': nrm((BLOCK_SIZE, E)),
        'biasS_w': nrm((S, 1)), 'biasS_b': jnp.zeros((1,), _F32),
        'lnf_w': jnp.ones((E,), _F32), 'lnf_b': jnp.zeros((E,), _F32),
        'act_w1': nrm((E, E), 0.1), 'act_b1': jnp.zeros((E,), _F32),
        'act_w2': nrm((E, A), 0.1), 'act_b2': jnp.full((A,), 1e-6, _F32),
        'a_std_log': jnp.full((1, A), -0.5, _F32),   # unused in forward()
        'layers': [],
    }
    for _ in range(N_BLOCKS):
        lp = {
            'ln1_w': jnp.ones((E,), _F32), 'ln1_b': jnp.zeros((E,), _F32),
            'ln2_w': jnp.ones((E,), _F32), 'ln2_b': jnp.zeros((E,), _F32),
            'wq': nrm((E, E)), 'bq': nrm((E,)),
            'wk': nrm((E, E)), 'bk': nrm((E,)),
            'wv': nrm((E, E)), 'bv': nrm((E,)),
            'wp': nrm((E, E)), 'bp': nrm((E,)),
            'mlp_w1': nrm((E, 2 * E)), 'mlp_b1': nrm((2 * E,)),
            'mlp_w2': nrm((2 * E, E)), 'mlp_b2': nrm((E,)),
            'g1_w': nrm((6, E, E), 0.1),
            'g1_bz': jnp.full((E,), INIT_GRU_GATE_BIAS, _F32),
            'g2_w': nrm((6, E, E), 0.1),
            'g2_bz': jnp.full((E,), INIT_GRU_GATE_BIAS, _F32),
        }
        p['layers'].append(lp)
    return p


def pack_params(p):
    """One-time host-side (NumPy) packing into two 128-lane slabs.

    Call this ONCE and reuse the returned slabs for every forward call:
    all LayerNorm affines, the attention output projection, mlp_w2, the
    score scale and the GRU z-gate bias are folded into the packed weights.
    """
    E, S, A, Tk = N_EMBD, STATE_DIM, ACTION_DIM, BLOCK_SIZE
    scale = 1.0 / math.sqrt(HEAD_DIM)
    f = lambda a: np.asarray(a, np.float32)

    # ---------------- global slab ----------------
    g = np.zeros((_G_ROWS, 128), np.float32)
    tok_w, tok_b, pos = f(p['tok_w']), f(p['tok_b']), f(p['pos_emb'])
    g[0:S, 0:E] = tok_w
    g[0:S, E] = f(p['biasS_w'])[:, 0]
    g[S, E] = f(p['biasS_b'])[0]                       # picked up by the augmented "1" column
    g[_G_ADD:_G_ADD + B, 0:E] = tok_b[None, :] + pos[0:1, :]
    g[_G_ADD + _KV0:_G_ADD + _AB0, 0:E] = tok_b[None, :] + np.tile(pos[0:Tk, :], (B, 1))

    # K/V projection for all layers, ln1 affine folded in
    for l, lp in enumerate(p['layers']):
        ln1w, ln1b = f(lp['ln1_w']), f(lp['ln1_b'])
        wk, bk = f(lp['wk']), f(lp['bk'])
        wv, bv = f(lp['wv']), f(lp['bv'])
        g[_G_WKV:_G_WKV + E, 2 * E * l:2 * E * l + E] = ln1w[:, None] * wk
        g[_G_WKV:_G_WKV + E, 2 * E * l + E:2 * E * l + 2 * E] = ln1w[:, None] * wv
        g[_G_BKV, 2 * E * l:2 * E * l + E] = ln1b @ wk + bk
        g[_G_BKV, 2 * E * l + E:2 * E * l + 2 * E] = ln1b @ wv + bv

    # final head, lnf affine folded into act_w1/act_b1
    lnfw, lnfb = f(p['lnf_w']), f(p['lnf_b'])
    aw1, ab1 = f(p['act_w1']), f(p['act_b1'])
    aw2, ab2 = f(p['act_w2']), f(p['act_b2'])
    g[_G_BA1, 0:E] = lnfb @ aw1 + ab1
    g[_G_BA2, 0:A] = ab2
    hid = np.arange(E) // HEAD_DIM
    g[_G_HSUM:_G_HSUM + E, 0:E] = (hid[:, None] == hid[None, :]).astype(np.float32) * scale
    g[_G_HSUM:_G_HSUM + E, E:2 * E] = lnfw[:, None] * aw1
    g[_G_AW2:_G_AW2 + E, 0:A] = aw2

    # ---------------- per-layer slab ----------------
    w = np.zeros((N_BLOCKS, _W_ROWS, 128), np.float32)
    for l, lp in enumerate(p['layers']):
        ln1w, ln1b = f(lp['ln1_w']), f(lp['ln1_b'])
        ln2w, ln2b = f(lp['ln2_w']), f(lp['ln2_b'])
        wq, bq = f(lp['wq']), f(lp['bq'])
        wp, bp = f(lp['wp']), f(lp['bp'])
        m1, b1 = f(lp['mlp_w1']), f(lp['mlp_b1'])
        m2, b2 = f(lp['mlp_w2']), f(lp['mlp_b2'])
        g1w, g1bz = f(lp['g1_w']), f(lp['g1_bz'])
        g2w, g2bz = f(lp['g2_w']), f(lp['g2_bz'])

        # Q projection (ln1 folded) and MLP up-proj (ln2 folded)
        w[l, _W_QM:_W_QM + E, 0:E] = ln1w[:, None] * wq
        w[l, _W_BQ, 0:E] = ln1b @ wq + bq
        w[l, _W_QM:_W_QM + E, E:3 * E] = ln2w[:, None] * m1
        w[l, _W_BQ, E:3 * E] = ln2b @ m1 + b1

        # GRU gate 1: wp/bp folded into x-side; x/h fused by row stacking
        wxz1 = np.concatenate([g1w[0], g1w[1], g1w[2]], axis=1)          # (E, 3E)
        w[l, _W_G1:_W_G1 + E, 0:3 * E] = wp @ wxz1                       # x-side (y2)
        w[l, _W_G1 + E:_W_G1 + 2 * E, 0:2 * E] = np.concatenate([g1w[3], g1w[4]], axis=1)
        w[l, _W_BG1, 0:3 * E] = bp @ wxz1
        w[l, _W_BG1, E:2 * E] -= g1bz                                    # -bz on z slice
        w[l, _W_QM:_W_QM + E, 3 * E:4 * E] = g1w[5]                      # uh1

        # GRU gate 2: mlp_w2/mlp_b2 folded into x-side; x/h fused by row stacking
        wxz2 = np.concatenate([g2w[0], g2w[1], g2w[2]], axis=1)          # (E, 3E)
        w[l, _W_G2:_W_G2 + 2 * E, 0:3 * E] = m2 @ wxz2                   # x-side (h1)
        w[l, _W_G2 + 2 * E:_W_G2 + 3 * E, 0:2 * E] = np.concatenate([g2w[3], g2w[4]], axis=1)
        w[l, _W_BG2, 0:3 * E] = b2 @ wxz2
        w[l, _W_BG2, E:2 * E] -= g2bz
        w[l, _W_G1:_W_G1 + E, 3 * E:4 * E] = g2w[5]                      # uh2

    return jnp.asarray(g), jnp.asarray(w)


# ------------------------------- wrapper --------------------------------------
@jax.jit
def actor_forward_pallas(g_slab, w_slab, state, past_state, att_bias):
    if state.ndim == 1:
        state = state[None, :]
    bsz = state.shape[0]
    assert bsz == B and past_state.shape[1] == BLOCK_SIZE

    # Per-call work is only this tiny activation slab; all parameter packing is
    # done once, host-side, in pack_params().
    x_in = jnp.zeros((_XROWS, _XCOLS), _F32)
    x_in = x_in.at[0:bsz, 0:STATE_DIM].set(state.reshape(bsz, STATE_DIM).astype(_F32))
    x_in = x_in.at[_KV0:_KV0 + bsz * BLOCK_SIZE, 0:STATE_DIM].set(
        past_state.astype(_F32).reshape(bsz * BLOCK_SIZE, STATE_DIM))
    x_in = x_in.at[_AB0:_AB0 + BLOCK_SIZE, 0:STATE_DIM].set(att_bias[0].astype(_F32))
    x_in = x_in.at[_AB0:_AB0 + BLOCK_SIZE, STATE_DIM].set(1.0)

    vmem = lambda: pl.BlockSpec(memory_space=pltpu.MemorySpace.VMEM)
    out_pad = pl.pallas_call(
        _actor_ppo_att_kernel,
        out_shape=jax.ShapeDtypeStruct((B, _OUT_LANES), _F32),
        in_specs=[vmem(), vmem(), vmem()],
        out_specs=vmem(),
    )(x_in, g_slab, w_slab)
    return out_pad[:, :ACTION_DIM]


# --------------------------- pure-JAX reference --------------------------------
def _layernorm_ref(x, w, b):
    mu = x.mean(-1, keepdims=True)
    var = ((x - mu) ** 2).mean(-1, keepdims=True)
    return (x - mu) / jnp.sqrt(var + LN_EPS) * w + b


def _gru_ref(h, x, W, bz):
    r = jax.nn.sigmoid(x @ W[0] + h @ W[3])
    z = jax.nn.sigmoid(x @ W[1] + h @ W[4] - bz)
    hn = jnp.tanh(x @ W[2] + (h * r) @ W[5])
    return (1.0 - z) * h + z * hn


def _attn_ref(q, k, v, lp, bias):
    B_, Tq, E = q.shape
    Tk = k.shape[1]
    hd = E // N_HEAD
    Q = (q @ lp['wq'] + lp['bq']).reshape(B_, Tq, N_HEAD, hd).transpose(0, 2, 1, 3)
    K = (k @ lp['wk'] + lp['bk']).reshape(B_, Tk, N_HEAD, hd).transpose(0, 2, 1, 3)
    V = (v @ lp['wv'] + lp['bv']).reshape(B_, Tk, N_HEAD, hd).transpose(0, 2, 1, 3)
    att = (Q @ jnp.swapaxes(K, -1, -2)) * (1.0 / math.sqrt(hd)) + bias
    pr = jax.nn.softmax(att, axis=-1)
    y = (pr @ V).transpose(0, 2, 1, 3).reshape(B_, Tq, E)
    return y @ lp['wp'] + lp['bp']


def reference_forward(p, state, past_state, att_bias):
    if state.ndim == 1:
        state = state[None, :]
    q = state.reshape(state.shape[0], 1, -1)
    k = past_state
    v = k
    b, t_q, _ = q.shape
    t_k = k.shape[1]

    ab = jnp.broadcast_to(att_bias[None, None], (b, N_HEAD, t_q, t_k, STATE_DIM))
    att_biasS = (ab @ p['biasS_w'])[..., 0] + p['biasS_b'][0]          # (b, H, Tq, Tk)

    qe = q @ p['tok_w'] + p['tok_b'] + p['pos_emb'][None, :t_q, :]
    ke = k @ p['tok_w'] + p['tok_b'] + p['pos_emb'][None, :t_k, :]
    ve = v @ p['tok_w'] + p['tok_b'] + p['pos_emb'][None, :t_k, :]

    for lp in p['layers']:
        qn = _layernorm_ref(qe, lp['ln1_w'], lp['ln1_b'])
        kn = _layernorm_ref(ke, lp['ln1_w'], lp['ln1_b'])
        vn = _layernorm_ref(ve, lp['ln1_w'], lp['ln1_b'])
        att = _attn_ref(qn, kn, vn, lp, att_biasS)
        x = _gru_ref(qe, att, lp['g1_w'], lp['g1_bz'])
        h2 = gelu(_layernorm_ref(x, lp['ln2_w'], lp['ln2_b']) @ lp['mlp_w1'] + lp['mlp_b1'])
        h2 = h2 @ lp['mlp_w2'] + lp['mlp_b2']
        qe = _gru_ref(x, h2, lp['g2_w'], lp['g2_bz'])

    feat = _layernorm_ref(qe, p['lnf_w'], p['lnf_b']).mean(axis=1)
    a1 = gelu(feat @ p['act_w1'] + p['act_b1'])
    return jnp.tanh(a1 @ p['act_w2'] + p['act_b2'])


# ---------------------------------- main ---------------------------------------
if __name__ == "__main__":
    key = jax.random.PRNGKey(0)
    kp, k1, k2, k3 = jax.random.split(key, 4)
    params = init_params(kp)

    state = jax.random.normal(k1, (B, STATE_DIM), _F32)
    past_state = jax.random.normal(k2, (B, BLOCK_SIZE, STATE_DIM), _F32)
    att_bias = jax.random.normal(k3, (T_Q, BLOCK_SIZE, STATE_DIM), _F32)

    # one-time packing (cache these slabs across all inference calls)
    g_slab, w_slab = pack_params(params)

    out = actor_forward_pallas(g_slab, w_slab, state, past_state, att_bias)
    out = jax.block_until_ready(out)

    ref = jax.block_until_ready(reference_forward(params, state, past_state, att_bias))
    assert out.shape == (B, ACTION_DIM)
    np.testing.assert_allclose(np.asarray(out), np.asarray(ref), rtol=5e-3, atol=5e-3)

    print("KERNEL_OK")
</pallas_src>

<mosaic_0001>
module attributes {stable_mosaic.version = 11 : i64} {
  func.func @_actor_ppo_att_kernel(%arg0: memref<32x16xf32, #tpu.memory_space<vmem>>, %arg1: memref<152x128xf32, #tpu.memory_space<vmem>>, %arg2: memref<2x200x128xf32, #tpu.memory_space<vmem>>, %arg3: memref<2x128xf32, #tpu.memory_space<vmem>>) attributes {dimension_semantics = [], scalar_prefetch = 0 : i64, scratch_operands = 0 : i64, tpu.core_type = #tpu.core_type<tc>} {
    %c0 = arith.constant 0 : index
    %c0_0 = arith.constant 0 : index
    %0 = vector.load %arg0[%c0, %c0_0] : memref<32x16xf32, #tpu.memory_space<vmem>>, vector<32x16xf32>
    %c0_1 = arith.constant 0 : index
    %c0_2 = arith.constant 0 : index
    %1 = vector.load %arg1[%c0_1, %c0_2] : memref<152x128xf32, #tpu.memory_space<vmem>>, vector<16x128xf32>
    %cst = arith.constant dense<0.000000e+00> : vector<32x128xf32>
    %2 = tpu.matmul %0, %1, %cst {dimension_numbers = #tpu.dot_dimension_numbers<[1], [0], [0], [1], [0, 0, 1, 1], [], []>} : vector<32x16xf32>, vector<16x128xf32>, vector<32x128xf32> -> vector<32x128xf32>
    %c16 = arith.constant 16 : index
    %c0_3 = arith.constant 0 : index
    %3 = vector.load %arg1[%c16, %c0_3] : memref<152x128xf32, #tpu.memory_space<vmem>>, vector<32x128xf32>
    %4 = arith.addf %2, %3 : vector<32x128xf32>
    %5 = vector.extract_strided_slice %4 {offsets = [0, 0], sizes = [2, 32], strides = [1, 1]} : vector<32x128xf32> to vector<2x32xf32>
    %6 = vector.extract_strided_slice %4 {offsets = [8, 0], sizes = [16, 32], strides = [1, 1]} : vector<32x128xf32> to vector<16x32xf32>
    %7 = vector.extract_strided_slice %4 {offsets = [24, 32], sizes = [8, 1], strides = [1, 1]} : vector<32x128xf32> to vector<8x1xf32>
    %cst_4 = arith.constant dense<0.000000e+00> : vector<16xf32>
    %8 = vector.multi_reduction <add>, %6, %cst_4 [1] : vector<16x32xf32> to vector<16xf32>
    %9 = vector.shape_cast %8 : vector<16xf32> to vector<16x1xf32>
    %cst_5 = arith.constant 3.200000e+01 : f32
    %10 = vector.broadcast %cst_5 : f32 to vector<16x1xf32>
    %11 = arith.divf %9, %10 : vector<16x1xf32>
    %12 = vector.broadcast %11 : vector<16x1xf32> to vector<16x32xf32>
    %13 = arith.subf %6, %12 : vector<16x32xf32>
    %14 = arith.mulf %13, %13 : vector<16x32xf32>
    %cst_6 = arith.constant dense<0.000000e+00> : vector<16xf32>
    %15 = vector.multi_reduction <add>, %14, %cst_6 [1] : vector<16x32xf32> to vector<16xf32>
    %16 = vector.shape_cast %15 : vector<16xf32> to vector<16x1xf32>
    %cst_7 = arith.constant 3.200000e+01 : f32
    %17 = vector.broadcast %cst_7 : f32 to vector<16x1xf32>
    %18 = arith.divf %16, %17 : vector<16x1xf32>
    %cst_8 = arith.constant 9.99999974E-6 : f32
    %19 = vector.broadcast %cst_8 : f32 to vector<16x1xf32>
    %20 = arith.addf %18, %19 : vector<16x1xf32>
    %21 = math.rsqrt %20 : vector<16x1xf32>
    %22 = vector.broadcast %21 : vector<16x1xf32> to vector<16x32xf32>
    %23 = arith.mulf %13, %22 : vector<16x32xf32>
    %c48 = arith.constant 48 : index
    %c0_9 = arith.constant 0 : index
    %24 = vector.load %arg1[%c48, %c0_9] : memref<152x128xf32, #tpu.memory_space<vmem>>, vector<32x128xf32>
    %cst_10 = arith.constant dense<0.000000e+00> : vector<16x128xf32>
    %25 = tpu.matmul %23, %24, %cst_10 {dimension_numbers = #tpu.dot_dimension_numbers<[1], [0], [0], [1], [0, 0, 1, 1], [], []>} : vector<16x32xf32>, vector<32x128xf32>, vector<16x128xf32> -> vector<16x128xf32>
    %c80 = arith.constant 80 : index
    %c0_11 = arith.constant 0 : index
    %26 = vector.load %arg1[%c80, %c0_11] : memref<152x128xf32, #tpu.memory_space<vmem>>, vector<1x128xf32>
    %27 = vector.broadcast %26 : vector<1x128xf32> to vector<16x128xf32>
    %28 = arith.addf %25, %27 : vector<16x128xf32>
    %c88 = arith.constant 88 : index
    %c0_12 = arith.constant 0 : index
    %29 = vector.load %arg1[%c88, %c0_12] : memref<152x128xf32, #tpu.memory_space<vmem>>, vector<32x32xf32>
    %c0_13 = arith.constant 0 : index
    %c0_14 = arith.constant 0 : index
    %c0_15 = arith.constant 0 : index
    %30 = vector.load %arg2[%c0_13, %c0_14, %c0_15] : memref<2x200x128xf32, #tpu.memory_space<vmem>>, vector<1x32x32xf32>
    %31 = vector.shape_cast %30 : vector<1x32x32xf32> to vector<32x32xf32>
    %c0_16 = arith.constant 0 : index
    %c0_17 = arith.constant 0 : index
    %c32 = arith.constant 32 : index
    %32 = vector.load %arg2[%c0_16, %c0_17, %c32] : memref<2x200x128xf32, #tpu.memory_space<vmem>>, vector<1x32x64xf32>
    %33 = vector.shape_cast %32 : vector<1x32x64xf32> to vector<32x64xf32>
    %c0_18 = arith.constant 0 : index
    %c0_19 = arith.constant 0 : index
    %c96 = arith.constant 96 : index
    %34 = vector.load %arg2[%c0_18, %c0_19, %c96] : memref<2x200x128xf32, #tpu.memory_space<vmem>>, vector<1x32x32xf32>
    %35 = vector.shape_cast %34 : vector<1x32x32xf32> to vector<32x32xf32>
    %c0_20 = arith.constant 0 : index
    %c32_21 = arith.constant 32 : index
    %c0_22 = arith.constant 0 : index
    %36 = vector.load %arg2[%c0_20, %c32_21, %c0_22] : memref<2x200x128xf32, #tpu.memory_space<vmem>>, vector<1x64x96xf32>
    %37 = vector.shape_cast %36 : vector<1x64x96xf32> to vector<64x96xf32>
    %c0_23 = arith.constant 0 : index
    %c32_24 = arith.constant 32 : index
    %c96_25 = arith.constant 96 : index
    %38 = vector.load %arg2[%c0_23, %c32_24, %c96_25] : memref<2x200x128xf32, #tpu.memory_space<vmem>>, vector<1x32x32xf32>
    %39 = vector.shape_cast %38 : vector<1x32x32xf32> to vector<32x32xf32>
    %c0_26 = arith.constant 0 : index
    %c96_27 = arith.constant 96 : index
    %c0_28 = arith.constant 0 : index
    %40 = vector.load %arg2[%c0_26, %c96_27, %c0_28] : memref<2x200x128xf32, #tpu.memory_space<vmem>>, vector<1x96x96xf32>
    %41 = vector.shape_cast %40 : vector<1x96x96xf32> to vector<96x96xf32>
    %c0_29 = arith.constant 0 : index
    %c192 = arith.constant 192 : index
    %c0_30 = arith.constant 0 : index
    %42 = vector.load %arg2[%c0_29, %c192, %c0_30] : memref<2x200x128xf32, #tpu.memory_space<vmem>>, vector<1x1x32xf32>
    %43 = vector.shape_cast %42 : vector<1x1x32xf32> to vector<1x32xf32>
    %c0_31 = arith.constant 0 : index
    %c192_32 = arith.constant 192 : index
    %c32_33 = arith.constant 32 : index
    %44 = vector.load %arg2[%c0_31, %c192_32, %c32_33] : memref<2x200x128xf32, #tpu.memory_space<vmem>>, vector<1x1x64xf32>
    %45 = vector.shape_cast %44 : vector<1x1x64xf32> to vector<1x64xf32>
    %c0_34 = arith.constant 0 : index
    %c193 = arith.constant 193 : index
    %c0_35 = arith.constant 0 : index
    %46 = vector.load %arg2[%c0_34, %c193, %c0_35] : memref<2x200x128xf32, #tpu.memory_space<vmem>>, vector<1x1x96xf32>
    %47 = vector.shape_cast %46 : vector<1x1x96xf32> to vector<1x96xf32>
    %c0_36 = arith.constant 0 : index
    %c194 = arith.constant 194 : index
    %c0_37 = arith.constant 0 : index
    %48 = vector.load %arg2[%c0_36, %c194, %c0_37] : memref<2x200x128xf32, #tpu.memory_space<vmem>>, vector<1x1x96xf32>
    %49 = vector.shape_cast %48 : vector<1x1x96xf32> to vector<1x96xf32>
    %cst_38 = arith.constant dense<0.000000e+00> : vector<2xf32>
    %50 = vector.multi_reduction <add>, %5, %cst_38 [1] : vector<2x32xf32> to vector<2xf32>
    %51 = vector.shape_cast %50 : vector<2xf32> to vector<2x1xf32>
    %cst_39 = arith.constant 3.200000e+01 : f32
    %52 = vector.broadcast %cst_39 : f32 to vector<2x1xf32>
    %53 = arith.divf %51, %52 : vector<2x1xf32>
    %54 = vector.broadcast %53 : vector<2x1xf32> to vector<2x32xf32>
    %55 = arith.subf %5, %54 : vector<2x32xf32>
    %56 = arith.mulf %55, %55 : vector<2x32xf32>
    %cst_40 = arith.constant dense<0.000000e+00> : vector<2xf32>
    %57 = vector.multi_reduction <add>, %56, %cst_40 [1] : vector<2x32xf32> to vector<2xf32>
    %58 = vector.shape_cast %57 : vector<2xf32> to vector<2x1xf32>
    %cst_41 = arith.constant 3.200000e+01 : f32
    %59 = vector.broadcast %cst_41 : f32 to vector<2x1xf32>
    %60 = arith.divf %58, %59 : vector<2x1xf32>
    %cst_42 = arith.constant 9.99999974E-6 : f32
    %61 = vector.broadcast %cst_42 : f32 to vector<2x1xf32>
    %62 = arith.addf %60, %61 : vector<2x1xf32>
    %63 = math.rsqrt %62 : vector<2x1xf32>
    %64 = vector.broadcast %63 : vector<2x1xf32> to vector<2x32xf32>
    %65 = arith.mulf %55, %64 : vector<2x32xf32>
    %cst_43 = arith.constant dense<0.000000e+00> : vector<2x32xf32>
    %66 = tpu.matmul %65, %31, %cst_43 {dimension_numbers = #tpu.dot_dimension_numbers<[1], [0], [0], [1], [0, 0, 1, 1], [], []>} : vector<2x32xf32>, vector<32x32xf32>, vector<2x32xf32> -> vector<2x32xf32>
    %67 = vector.broadcast %43 : vector<1x32xf32> to vector<2x32xf32>
    %68 = arith.addf %66, %67 : vector<2x32xf32>
    %69 = vector.extract_strided_slice %28 {offsets = [0, 0], sizes = [16, 32], strides = [1, 1]} : vector<16x128xf32> to vector<16x32xf32>
    %70 = vector.shape_cast %69 : vector<16x32xf32> to vector<2x8x32xf32>
    %71 = vector.extract_strided_slice %28 {offsets = [0, 32], sizes = [16, 32], strides = [1, 1]} : vector<16x128xf32> to vector<16x32xf32>
    %72 = vector.shape_cast %71 : vector<16x32xf32> to vector<2x8x32xf32>
    %73 = vector.shape_cast %68 : vector<2x32xf32> to vector<2x1x32xf32>
    %74 = vector.broadcast %73 : vector<2x1x32xf32> to vector<2x8x32xf32>
    %75 = arith.mulf %74, %70 : vector<2x8x32xf32>
    %76 = vector.shape_cast %75 : vector<2x8x32xf32> to vector<16x32xf32>
    %cst_44 = arith.constant dense<0.000000e+00> : vector<16x32xf32>
    %77 = tpu.matmul %76, %29, %cst_44 {dimension_numbers = #tpu.dot_dimension_numbers<[1], [0], [0], [1], [0, 0, 1, 1], [], []>} : vector<16x32xf32>, vector<32x32xf32>, vector<16x32xf32> -> vector<16x32xf32>
    %78 = vector.shape_cast %77 : vector<16x32xf32> to vector<2x8x32xf32>
    %79 = vector.shape_cast %7 : vector<8x1xf32> to vector<1x8x1xf32>
    %80 = vector.broadcast %79 : vector<1x8x1xf32> to vector<2x8x32xf32>
    %81 = arith.addf %78, %80 : vector<2x8x32xf32>
    %cst_45 = arith.constant dense<0xFF800000> : vector<2x32xf32>
    %82 = vector.multi_reduction <maximumf>, %81, %cst_45 [1] : vector<2x8x32xf32> to vector<2x32xf32>
    %83 = vector.shape_cast %82 : vector<2x32xf32> to vector<2x1x32xf32>
    %84 = vector.broadcast %83 : vector<2x1x32xf32> to vector<2x8x32xf32>
    %85 = arith.subf %81, %84 : vector<2x8x32xf32>
    %86 = math.exp %85 : vector<2x8x32xf32>
    %cst_46 = arith.constant dense<0.000000e+00> : vector<2x32xf32>
    %87 = vector.multi_reduction <add>, %86, %cst_46 [1] : vector<2x8x32xf32> to vector<2x32xf32>
    %88 = vector.shape_cast %87 : vector<2x32xf32> to vector<2x1x32xf32>
    %89 = tpu.reciprocal %88 {approx = true} : vector<2x1x32xf32> -> vector<2x1x32xf32>
    %90 = vector.broadcast %89 : vector<2x1x32xf32> to vector<2x8x32xf32>
    %91 = arith.mulf %86, %90 : vector<2x8x32xf32>
    %92 = arith.mulf %91, %72 : vector<2x8x32xf32>
    %cst_47 = arith.constant dense<0.000000e+00> : vector<2x32xf32>
    %93 = vector.multi_reduction <add>, %92, %cst_47 [1] : vector<2x8x32xf32> to vector<2x32xf32>
    %94 = tpu.concatenate %93, %5 in 1 : vector<2x32xf32>, vector<2x32xf32> -> vector<2x64xf32>
    %cst_48 = arith.constant dense<0.000000e+00> : vector<2x96xf32>
    %95 = tpu.matmul %94, %37, %cst_48 {dimension_numbers = #tpu.dot_dimension_numbers<[1], [0], [0], [1], [0, 0, 1, 1], [], []>} : vector<2x64xf32>, vector<64x96xf32>, vector<2x96xf32> -> vector<2x96xf32>
    %96 = vector.broadcast %47 : vector<1x96xf32> to vector<2x96xf32>
    %97 = arith.addf %95, %96 : vector<2x96xf32>
    %98 = vector.extract_strided_slice %97 {offsets = [0, 0], sizes = [2, 32], strides = [1, 1]} : vector<2x96xf32> to vector<2x32xf32>
    %cst_49 = arith.constant 5.000000e-01 : f32
    %99 = vector.broadcast %cst_49 : f32 to vector<2x32xf32>
    %100 = arith.mulf %99, %98 : vector<2x32xf32>
    %101 = math.tanh %100 : vector<2x32xf32>
    %cst_50 = arith.constant 1.000000e+00 : f32
    %102 = vector.broadcast %cst_50 : f32 to vector<2x32xf32>
    %103 = arith.addf %101, %102 : vector<2x32xf32>
    %cst_51 = arith.constant 5.000000e-01 : f32
    %104 = vector.broadcast %cst_51 : f32 to vector<2x32xf32>
    %105 = arith.mulf %104, %103 : vector<2x32xf32>
    %106 = vector.extract_strided_slice %97 {offsets = [0, 32], sizes = [2, 32], strides = [1, 1]} : vector<2x96xf32> to vector<2x32xf32>
    %cst_52 = arith.constant 5.000000e-01 : f32
    %107 = vector.broadcast %cst_52 : f32 to vector<2x32xf32>
    %108 = arith.mulf %107, %106 : vector<2x32xf32>
    %109 = math.tanh %108 : vector<2x32xf32>
    %cst_53 = arith.constant 1.000000e+00 : f32
    %110 = vector.broadcast %cst_53 : f32 to vector<2x32xf32>
    %111 = arith.addf %109, %110 : vector<2x32xf32>
    %cst_54 = arith.constant 5.000000e-01 : f32
    %112 = vector.broadcast %cst_54 : f32 to vector<2x32xf32>
    %113 = arith.mulf %112, %111 : vector<2x32xf32>
    %114 = vector.extract_strided_slice %97 {offsets = [0, 64], sizes = [2, 32], strides = [1, 1]} : vector<2x96xf32> to vector<2x32xf32>
    %115 = arith.mulf %5, %105 : vector<2x32xf32>
    %cst_55 = arith.constant dense<0.000000e+00> : vector<2x32xf32>
    %116 = tpu.matmul %115, %35, %cst_55 {dimension_numbers = #tpu.dot_dimension_numbers<[1], [0], [0], [1], [0, 0, 1, 1], [], []>} : vector<2x32xf32>, vector<32x32xf32>, vector<2x32xf32> -> vector<2x32xf32>
    %117 = arith.addf %114, %116 : vector<2x32xf32>
    %118 = math.tanh %117 : vector<2x32xf32>
    %cst_56 = arith.constant 1.000000e+00 : f32
    %119 = vector.broadcast %cst_56 : f32 to vector<2x32xf32>
    %120 = arith.subf %119, %113 : vector<2x32xf32>
    %121 = arith.mulf %120, %5 : vector<2x32xf32>
    %122 = arith.mulf %113, %118 : vector<2x32xf32>
    %123 = arith.addf %121, %122 : vector<2x32xf32>
    %cst_57 = arith.constant dense<0.000000e+00> : vector<2xf32>
    %124 = vector.multi_reduction <add>, %123, %cst_57 [1] : vector<2x32xf32> to vector<2xf32>
    %125 = vector.shape_cast %124 : vector<2xf32> to vector<2x1xf32>
    %cst_58 = arith.constant 3.200000e+01 : f32
    %126 = vector.broadcast %cst_58 : f32 to vector<2x1xf32>
    %127 = arith.divf %125, %126 : vector<2x1xf32>
    %128 = vector.broadcast %127 : vector<2x1xf32> to vector<2x32xf32>
    %129 = arith.subf %123, %128 : vector<2x32xf32>
    %130 = arith.mulf %129, %129 : vector<2x32xf32>
    %cst_59 = arith.constant dense<0.000000e+00> : vector<2xf32>
    %131 = vector.multi_reduction <add>, %130, %cst_59 [1] : vector<2x32xf32> to vector<2xf32>
    %132 = vector.shape_cast %131 : vector<2xf32> to vector<2x1xf32>
    %cst_60 = arith.constant 3.200000e+01 : f32
    %133 = vector.broadcast %cst_60 : f32 to vector<2x1xf32>
    %134 = arith.divf %132, %133 : vector<2x1xf32>
    %cst_61 = arith.constant 9.99999974E-6 : f32
    %135 = vector.broadcast %cst_61 : f32 to vector<2x1xf32>
    %136 = arith.addf %134, %135 : vector<2x1xf32>
    %137 = math.rsqrt %136 : vector<2x1xf32>
    %138 = vector.broadcast %137 : vector<2x1xf32> to vector<2x32xf32>
    %139 = arith.mulf %129, %138 : vector<2x32xf32>
    %cst_62 = arith.constant dense<0.000000e+00> : vector<2x64xf32>
    %140 = tpu.matmul %139, %33, %cst_62 {dimension_numbers = #tpu.dot_dimension_numbers<[1], [0], [0], [1], [0, 0, 1, 1], [], []>} : vector<2x32xf32>, vector<32x64xf32>, vector<2x64xf32> -> vector<2x64xf32>
    %141 = vector.broadcast %45 : vector<1x64xf32> to vector<2x64xf32>
    %142 = arith.addf %140, %141 : vector<2x64xf32>
    %cst_63 = arith.constant 5.000000e-01 : f32
    %143 = vector.broadcast %cst_63 : f32 to vector<2x64xf32>
    %144 = arith.mulf %143, %142 : vector<2x64xf32>
    %cst_64 = arith.constant 0.707106769 : f32
    %145 = vector.broadcast %cst_64 : f32 to vector<2x64xf32>
    %146 = arith.mulf %142, %145 : vector<2x64xf32>
    %cst_65 = arith.constant 0.000000e+00 : f32
    %147 = vector.broadcast %cst_65 : f32 to vector<2x64xf32>
    %148 = arith.cmpf olt, %146, %147 : vector<2x64xf32>
    %cst_66 = arith.constant -1.000000e+00 : f32
    %cst_67 = arith.constant 1.000000e+00 : f32
    %149 = vector.broadcast %cst_66 : f32 to vector<2x64xf32>
    %150 = vector.broadcast %cst_67 : f32 to vector<2x64xf32>
    %151 = arith.select %148, %149, %150 : vector<2x64xi1>, vector<2x64xf32>
    %152 = math.absf %146 : vector<2x64xf32>
    %cst_68 = arith.constant 0.327591091 : f32
    %153 = vector.broadcast %cst_68 : f32 to vector<2x64xf32>
    %154 = arith.mulf %153, %152 : vector<2x64xf32>
    %cst_69 = arith.constant 1.000000e+00 : f32
    %155 = vector.broadcast %cst_69 : f32 to vector<2x64xf32>
    %156 = arith.addf %155, %154 : vector<2x64xf32>
    %cst_70 = arith.constant 1.000000e+00 : f32
    %157 = vector.broadcast %cst_70 : f32 to vector<2x64xf32>
    %158 = arith.divf %157, %156 : vector<2x64xf32>
    %cst_71 = arith.constant 1.06140542 : f32
    %159 = vector.broadcast %cst_71 : f32 to vector<2x64xf32>
    %160 = arith.mulf %159, %158 : vector<2x64xf32>
    %cst_72 = arith.constant -1.45315206 : f32
    %161 = vector.broadcast %cst_72 : f32 to vector<2x64xf32>
    %162 = arith.addf %160, %161 : vector<2x64xf32>
    %163 = arith.mulf %162, %158 : vector<2x64xf32>
    %cst_73 = arith.constant 1.42141378 : f32
    %164 = vector.broadcast %cst_73 : f32 to vector<2x64xf32>
    %165 = arith.addf %163, %164 : vector<2x64xf32>
    %166 = arith.mulf %165, %158 : vector<2x64xf32>
    %cst_74 = arith.constant -0.284496725 : f32
    %167 = vector.broadcast %cst_74 : f32 to vector<2x64xf32>
    %168 = arith.addf %166, %167 : vector<2x64xf32>
    %169 = arith.mulf %168, %158 : vector<2x64xf32>
    %cst_75 = arith.constant 0.254829586 : f32
    %170 = vector.broadcast %cst_75 : f32 to vector<2x64xf32>
    %171 = arith.addf %169, %170 : vector<2x64xf32>
    %172 = arith.mulf %171, %158 : vector<2x64xf32>
    %cst_76 = arith.constant 0.000000e+00 : f32
    %173 = vector.broadcast %cst_76 : f32 to vector<2x64xf32>
    %174 = arith.subf %173, %152 : vector<2x64xf32>
    %175 = arith.mulf %174, %152 : vector<2x64xf32>
    %176 = math.exp %175 : vector<2x64xf32>
    %177 = arith.mulf %172, %176 : vector<2x64xf32>
    %cst_77 = arith.constant 1.000000e+00 : f32
    %178 = vector.broadcast %cst_77 : f32 to vector<2x64xf32>
    %179 = arith.subf %178, %177 : vector<2x64xf32>
    %180 = arith.mulf %151, %179 : vector<2x64xf32>
    %cst_78 = arith.constant 1.000000e+00 : f32
    %181 = vector.broadcast %cst_78 : f32 to vector<2x64xf32>
    %182 = arith.addf %181, %180 : vector<2x64xf32>
    %183 = arith.mulf %144, %182 : vector<2x64xf32>
    %184 = tpu.concatenate %183, %123 in 1 : vector<2x64xf32>, vector<2x32xf32> -> vector<2x96xf32>
    %cst_79 = arith.constant dense<0.000000e+00> : vector<2x96xf32>
    %185 = tpu.matmul %184, %41, %cst_79 {dimension_numbers = #tpu.dot_dimension_numbers<[1], [0], [0], [1], [0, 0, 1, 1], [], []>} : vector<2x96xf32>, vector<96x96xf32>, vector<2x96xf32> -> vector<2x96xf32>
    %186 = vector.broadcast %49 : vector<1x96xf32> to vector<2x96xf32>
    %187 = arith.addf %185, %186 : vector<2x96xf32>
    %188 = vector.extract_strided_slice %187 {offsets = [0, 0], sizes = [2, 32], strides = [1, 1]} : vector<2x96xf32> to vector<2x32xf32>
    %cst_80 = arith.constant 5.000000e-01 : f32
    %189 = vector.broadcast %cst_80 : f32 to vector<2x32xf32>
    %190 = arith.mulf %189, %188 : vector<2x32xf32>
    %191 = math.tanh %190 : vector<2x32xf32>
    %cst_81 = arith.constant 1.000000e+00 : f32
    %192 = vector.broadcast %cst_81 : f32 to vector<2x32xf32>
    %193 = arith.addf %191, %192 : vector<2x32xf32>
    %cst_82 = arith.constant 5.000000e-01 : f32
    %194 = vector.broadcast %cst_82 : f32 to vector<2x32xf32>
    %195 = arith.mulf %194, %193 : vector<2x32xf32>
    %196 = vector.extract_strided_slice %187 {offsets = [0, 32], sizes = [2, 32], strides = [1, 1]} : vector<2x96xf32> to vector<2x32xf32>
    %cst_83 = arith.constant 5.000000e-01 : f32
    %197 = vector.broadcast %cst_83 : f32 to vector<2x32xf32>
    %198 = arith.mulf %197, %196 : vector<2x32xf32>
    %199 = math.tanh %198 : vector<2x32xf32>
    %cst_84 = arith.constant 1.000000e+00 : f32
    %200 = vector.broadcast %cst_84 : f32 to vector<2x32xf32>
    %201 = arith.addf %199, %200 : vector<2x32xf32>
    %cst_85 = arith.constant 5.000000e-01 : f32
    %202 = vector.broadcast %cst_85 : f32 to vector<2x32xf32>
    %203 = arith.mulf %202, %201 : vector<2x32xf32>
    %204 = vector.extract_strided_slice %187 {offsets = [0, 64], sizes = [2, 32], strides = [1, 1]} : vector<2x96xf32> to vector<2x32xf32>
    %205 = arith.mulf %123, %195 : vector<2x32xf32>
    %cst_86 = arith.constant dense<0.000000e+00> : vector<2x32xf32>
    %206 = tpu.matmul %205, %39, %cst_86 {dimension_numbers = #tpu.dot_dimension_numbers<[1], [0], [0], [1], [0, 0, 1, 1], [], []>} : vector<2x32xf32>, vector<32x32xf32>, vector<2x32xf32> -> vector<2x32xf32>
    %207 = arith.addf %204, %206 : vector<2x32xf32>
    %208 = math.tanh %207 : vector<2x32xf32>
    %cst_87 = arith.constant 1.000000e+00 : f32
    %209 = vector.broadcast %cst_87 : f32 to vector<2x32xf32>
    %210 = arith.subf %209, %203 : vector<2x32xf32>
    %211 = arith.mulf %210, %123 : vector<2x32xf32>
    %212 = arith.mulf %203, %208 : vector<2x32xf32>
    %213 = arith.addf %211, %212 : vector<2x32xf32>
    %c1 = arith.constant 1 : index
    %c0_88 = arith.constant 0 : index
    %c0_89 = arith.constant 0 : index
    %214 = vector.load %arg2[%c1, %c0_88, %c0_89] : memref<2x200x128xf32, #tpu.memory_space<vmem>>, vector<1x32x32xf32>
    %215 = vector.shape_cast %214 : vector<1x32x32xf32> to vector<32x32xf32>
    %c1_90 = arith.constant 1 : index
    %c0_91 = arith.constant 0 : index
    %c32_92 = arith.constant 32 : index
    %216 = vector.load %arg2[%c1_90, %c0_91, %c32_92] : memref<2x200x128xf32, #tpu.memory_space<vmem>>, vector<1x32x64xf32>
    %217 = vector.shape_cast %216 : vector<1x32x64xf32> to vector<32x64xf32>
    %c1_93 = arith.constant 1 : index
    %c0_94 = arith.constant 0 : index
    %c96_95 = arith.constant 96 : index
    %218 = vector.load %arg2[%c1_93, %c0_94, %c96_95] : memref<2x200x128xf32, #tpu.memory_space<vmem>>, vector<1x32x32xf32>
    %219 = vector.shape_cast %218 : vector<1x32x32xf32> to vector<32x32xf32>
    %c1_96 = arith.constant 1 : index
    %c32_97 = arith.constant 32 : index
    %c0_98 = arith.constant 0 : index
    %220 = vector.load %arg2[%c1_96, %c32_97, %c0_98] : memref<2x200x128xf32, #tpu.memory_space<vmem>>, vector<1x64x96xf32>
    %221 = vector.shape_cast %220 : vector<1x64x96xf32> to vector<64x96xf32>
    %c1_99 = arith.constant 1 : index
    %c32_100 = arith.constant 32 : index
    %c96_101 = arith.constant 96 : index
    %222 = vector.load %arg2[%c1_99, %c32_100, %c96_101] : memref<2x200x128xf32, #tpu.memory_space<vmem>>, vector<1x32x32xf32>
    %223 = vector.shape_cast %222 : vector<1x32x32xf32> to vector<32x32xf32>
    %c1_102 = arith.constant 1 : index
    %c96_103 = arith.constant 96 : index
    %c0_104 = arith.constant 0 : index
    %224 = vector.load %arg2[%c1_102, %c96_103, %c0_104] : memref<2x200x128xf32, #tpu.memory_space<vmem>>, vector<1x96x96xf32>
    %225 = vector.shape_cast %224 : vector<1x96x96xf32> to vector<96x96xf32>
    %c1_105 = arith.constant 1 : index
    %c192_106 = arith.constant 192 : index
    %c0_107 = arith.constant 0 : index
    %226 = vector.load %arg2[%c1_105, %c192_106, %c0_107] : memref<2x200x128xf32, #tpu.memory_space<vmem>>, vector<1x1x32xf32>
    %227 = vector.shape_cast %226 : vector<1x1x32xf32> to vector<1x32xf32>
    %c1_108 = arith.constant 1 : index
    %c192_109 = arith.constant 192 : index
    %c32_110 = arith.constant 32 : index
    %228 = vector.load %arg2[%c1_108, %c192_109, %c32_110] : memref<2x200x128xf32, #tpu.memory_space<vmem>>, vector<1x1x64xf32>
    %229 = vector.shape_cast %228 : vector<1x1x64xf32> to vector<1x64xf32>
    %c1_111 = arith.constant 1 : index
    %c193_112 = arith.constant 193 : index
    %c0_113 = arith.constant 0 : index
    %230 = vector.load %arg2[%c1_111, %c193_112, %c0_113] : memref<2x200x128xf32, #tpu.memory_space<vmem>>, vector<1x1x96xf32>
    %231 = vector.shape_cast %230 : vector<1x1x96xf32> to vector<1x96xf32>
    %c1_114 = arith.constant 1 : index
    %c194_115 = arith.constant 194 : index
    %c0_116 = arith.constant 0 : index
    %232 = vector.load %arg2[%c1_114, %c194_115, %c0_116] : memref<2x200x128xf32, #tpu.memory_space<vmem>>, vector<1x1x96xf32>
    %233 = vector.shape_cast %232 : vector<1x1x96xf32> to vector<1x96xf32>
    %cst_117 = arith.constant dense<0.000000e+00> : vector<2xf32>
    %234 = vector.multi_reduction <add>, %213, %cst_117 [1] : vector<2x32xf32> to vector<2xf32>
    %235 = vector.shape_cast %234 : vector<2xf32> to vector<2x1xf32>
    %cst_118 = arith.constant 3.200000e+01 : f32
    %236 = vector.broadcast %cst_118 : f32 to vector<2x1xf32>
    %237 = arith.divf %235, %236 : vector<2x1xf32>
    %238 = vector.broadcast %237 : vector<2x1xf32> to vector<2x32xf32>
    %239 = arith.subf %213, %238 : vector<2x32xf32>
    %240 = arith.mulf %239, %239 : vector<2x32xf32>
    %cst_119 = arith.constant dense<0.000000e+00> : vector<2xf32>
    %241 = vector.multi_reduction <add>, %240, %cst_119 [1] : vector<2x32xf32> to vector<2xf32>
    %242 = vector.shape_cast %241 : vector<2xf32> to vector<2x1xf32>
    %cst_120 = arith.constant 3.200000e+01 : f32
    %243 = vector.broadcast %cst_120 : f32 to vector<2x1xf32>
    %244 = arith.divf %242, %243 : vector<2x1xf32>
    %cst_121 = arith.constant 9.99999974E-6 : f32
    %245 = vector.broadcast %cst_121 : f32 to vector<2x1xf32>
    %246 = arith.addf %244, %245 : vector<2x1xf32>
    %247 = math.rsqrt %246 : vector<2x1xf32>
    %248 = vector.broadcast %247 : vector<2x1xf32> to vector<2x32xf32>
    %249 = arith.mulf %239, %248 : vector<2x32xf32>
    %cst_122 = arith.constant dense<0.000000e+00> : vector<2x32xf32>
    %250 = tpu.matmul %249, %215, %cst_122 {dimension_numbers = #tpu.dot_dimension_numbers<[1], [0], [0], [1], [0, 0, 1, 1], [], []>} : vector<2x32xf32>, vector<32x32xf32>, vector<2x32xf32> -> vector<2x32xf32>
    %251 = vector.broadcast %227 : vector<1x32xf32> to vector<2x32xf32>
    %252 = arith.addf %250, %251 : vector<2x32xf32>
    %253 = vector.extract_strided_slice %28 {offsets = [0, 64], sizes = [16, 32], strides = [1, 1]} : vector<16x128xf32> to vector<16x32xf32>
    %254 = vector.shape_cast %253 : vector<16x32xf32> to vector<2x8x32xf32>
    %255 = vector.extract_strided_slice %28 {offsets = [0, 96], sizes = [16, 32], strides = [1, 1]} : vector<16x128xf32> to vector<16x32xf32>
    %256 = vector.shape_cast %255 : vector<16x32xf32> to vector<2x8x32xf32>
    %257 = vector.shape_cast %252 : vector<2x32xf32> to vector<2x1x32xf32>
    %258 = vector.broadcast %257 : vector<2x1x32xf32> to vector<2x8x32xf32>
    %259 = arith.mulf %258, %254 : vector<2x8x32xf32>
    %260 = vector.shape_cast %259 : vector<2x8x32xf32> to vector<16x32xf32>
    %cst_123 = arith.constant dense<0.000000e+00> : vector<16x32xf32>
    %261 = tpu.matmul %260, %29, %cst_123 {dimension_numbers = #tpu.dot_dimension_numbers<[1], [0], [0], [1], [0, 0, 1, 1], [], []>} : vector<16x32xf32>, vector<32x32xf32>, vector<16x32xf32> -> vector<16x32xf32>
    %262 = vector.shape_cast %261 : vector<16x32xf32> to vector<2x8x32xf32>
    %263 = vector.shape_cast %7 : vector<8x1xf32> to vector<1x8x1xf32>
    %264 = vector.broadcast %263 : vector<1x8x1xf32> to vector<2x8x32xf32>
    %265 = arith.addf %262, %264 : vector<2x8x32xf32>
    %cst_124 = arith.constant dense<0xFF800000> : vector<2x32xf32>
    %266 = vector.multi_reduction <maximumf>, %265, %cst_124 [1] : vector<2x8x32xf32> to vector<2x32xf32>
    %267 = vector.shape_cast %266 : vector<2x32xf32> to vector<2x1x32xf32>
    %268 = vector.broadcast %267 : vector<2x1x32xf32> to vector<2x8x32xf32>
    %269 = arith.subf %265, %268 : vector<2x8x32xf32>
    %270 = math.exp %269 : vector<2x8x32xf32>
    %cst_125 = arith.constant dense<0.000000e+00> : vector<2x32xf32>
    %271 = vector.multi_reduction <add>, %270, %cst_125 [1] : vector<2x8x32xf32> to vector<2x32xf32>
    %272 = vector.shape_cast %271 : vector<2x32xf32> to vector<2x1x32xf32>
    %273 = tpu.reciprocal %272 {approx = true} : vector<2x1x32xf32> -> vector<2x1x32xf32>
    %274 = vector.broadcast %273 : vector<2x1x32xf32> to vector<2x8x32xf32>
    %275 = arith.mulf %270, %274 : vector<2x8x32xf32>
    %276 = arith.mulf %275, %256 : vector<2x8x32xf32>
    %cst_126 = arith.constant dense<0.000000e+00> : vector<2x32xf32>
    %277 = vector.multi_reduction <add>, %276, %cst_126 [1] : vector<2x8x32xf32> to vector<2x32xf32>
    %278 = tpu.concatenate %277, %213 in 1 : vector<2x32xf32>, vector<2x32xf32> -> vector<2x64xf32>
    %cst_127 = arith.constant dense<0.000000e+00> : vector<2x96xf32>
    %279 = tpu.matmul %278, %221, %cst_127 {dimension_numbers = #tpu.dot_dimension_numbers<[1], [0], [0], [1], [0, 0, 1, 1], [], []>} : vector<2x64xf32>, vector<64x96xf32>, vector<2x96xf32> -> vector<2x96xf32>
    %280 = vector.broadcast %231 : vector<1x96xf32> to vector<2x96xf32>
    %281 = arith.addf %279, %280 : vector<2x96xf32>
    %282 = vector.extract_strided_slice %281 {offsets = [0, 0], sizes = [2, 32], strides = [1, 1]} : vector<2x96xf32> to vector<2x32xf32>
    %cst_128 = arith.constant 5.000000e-01 : f32
    %283 = vector.broadcast %cst_128 : f32 to vector<2x32xf32>
    %284 = arith.mulf %283, %282 : vector<2x32xf32>
    %285 = math.tanh %284 : vector<2x32xf32>
    %cst_129 = arith.constant 1.000000e+00 : f32
    %286 = vector.broadcast %cst_129 : f32 to vector<2x32xf32>
    %287 = arith.addf %285, %286 : vector<2x32xf32>
    %cst_130 = arith.constant 5.000000e-01 : f32
    %288 = vector.broadcast %cst_130 : f32 to vector<2x32xf32>
    %289 = arith.mulf %288, %287 : vector<2x32xf32>
    %290 = vector.extract_strided_slice %281 {offsets = [0, 32], sizes = [2, 32], strides = [1, 1]} : vector<2x96xf32> to vector<2x32xf32>
    %cst_131 = arith.constant 5.000000e-01 : f32
    %291 = vector.broadcast %cst_131 : f32 to vector<2x32xf32>
    %292 = arith.mulf %291, %290 : vector<2x32xf32>
    %293 = math.tanh %292 : vector<2x32xf32>
    %cst_132 = arith.constant 1.000000e+00 : f32
    %294 = vector.broadcast %cst_132 : f32 to vector<2x32xf32>
    %295 = arith.addf %293, %294 : vector<2x32xf32>
    %cst_133 = arith.constant 5.000000e-01 : f32
    %296 = vector.broadcast %cst_133 : f32 to vector<2x32xf32>
    %297 = arith.mulf %296, %295 : vector<2x32xf32>
    %298 = vector.extract_strided_slice %281 {offsets = [0, 64], sizes = [2, 32], strides = [1, 1]} : vector<2x96xf32> to vector<2x32xf32>
    %299 = arith.mulf %213, %289 : vector<2x32xf32>
    %cst_134 = arith.constant dense<0.000000e+00> : vector<2x32xf32>
    %300 = tpu.matmul %299, %219, %cst_134 {dimension_numbers = #tpu.dot_dimension_numbers<[1], [0], [0], [1], [0, 0, 1, 1], [], []>} : vector<2x32xf32>, vector<32x32xf32>, vector<2x32xf32> -> vector<2x32xf32>
    %301 = arith.addf %298, %300 : vector<2x32xf32>
    %302 = math.tanh %301 : vector<2x32xf32>
    %cst_135 = arith.constant 1.000000e+00 : f32
    %303 = vector.broadcast %cst_135 : f32 to vector<2x32xf32>
    %304 = arith.subf %303, %297 : vector<2x32xf32>
    %305 = arith.mulf %304, %213 : vector<2x32xf32>
    %306 = arith.mulf %297, %302 : vector<2x32xf32>
    %307 = arith.addf %305, %306 : vector<2x32xf32>
    %cst_136 = arith.constant dense<0.000000e+00> : vector<2xf32>
    %308 = vector.multi_reduction <add>, %307, %cst_136 [1] : vector<2x32xf32> to vector<2xf32>
    %309 = vector.shape_cast %308 : vector<2xf32> to vector<2x1xf32>
    %cst_137 = arith.constant 3.200000e+01 : f32
    %310 = vector.broadcast %cst_137 : f32 to vector<2x1xf32>
    %311 = arith.divf %309, %310 : vector<2x1xf32>
    %312 = vector.broadcast %311 : vector<2x1xf32> to vector<2x32xf32>
    %313 = arith.subf %307, %312 : vector<2x32xf32>
    %314 = arith.mulf %313, %313 : vector<2x32xf32>
    %cst_138 = arith.constant dense<0.000000e+00> : vector<2xf32>
    %315 = vector.multi_reduction <add>, %314, %cst_138 [1] : vector<2x32xf32> to vector<2xf32>
    %316 = vector.shape_cast %315 : vector<2xf32> to vector<2x1xf32>
    %cst_139 = arith.constant 3.200000e+01 : f32
    %317 = vector.broadcast %cst_139 : f32 to vector<2x1xf32>
    %318 = arith.divf %316, %317 : vector<2x1xf32>
    %cst_140 = arith.constant 9.99999974E-6 : f32
    %319 = vector.broadcast %cst_140 : f32 to vector<2x1xf32>
    %320 = arith.addf %318, %319 : vector<2x1xf32>
    %321 = math.rsqrt %320 : vector<2x1xf32>
    %322 = vector.broadcast %321 : vector<2x1xf32> to vector<2x32xf32>
    %323 = arith.mulf %313, %322 : vector<2x32xf32>
    %cst_141 = arith.constant dense<0.000000e+00> : vector<2x64xf32>
    %324 = tpu.matmul %323, %217, %cst_141 {dimension_numbers = #tpu.dot_dimension_numbers<[1], [0], [0], [1], [0, 0, 1, 1], [], []>} : vector<2x32xf32>, vector<32x64xf32>, vector<2x64xf32> -> vector<2x64xf32>
    %325 = vector.broadcast %229 : vector<1x64xf32> to vector<2x64xf32>
    %326 = arith.addf %324, %325 : vector<2x64xf32>
    %cst_142 = arith.constant 5.000000e-01 : f32
    %327 = vector.broadcast %cst_142 : f32 to vector<2x64xf32>
    %328 = arith.mulf %327, %326 : vector<2x64xf32>
    %cst_143 = arith.constant 0.707106769 : f32
    %329 = vector.broadcast %cst_143 : f32 to vector<2x64xf32>
    %330 = arith.mulf %326, %329 : vector<2x64xf32>
    %cst_144 = arith.constant 0.000000e+00 : f32
    %331 = vector.broadcast %cst_144 : f32 to vector<2x64xf32>
    %332 = arith.cmpf olt, %330, %331 : vector<2x64xf32>
    %cst_145 = arith.constant -1.000000e+00 : f32
    %cst_146 = arith.constant 1.000000e+00 : f32
    %333 = vector.broadcast %cst_145 : f32 to vector<2x64xf32>
    %334 = vector.broadcast %cst_146 : f32 to vector<2x64xf32>
    %335 = arith.select %332, %333, %334 : vector<2x64xi1>, vector<2x64xf32>
    %336 = math.absf %330 : vector<2x64xf32>
    %cst_147 = arith.constant 0.327591091 : f32
    %337 = vector.broadcast %cst_147 : f32 to vector<2x64xf32>
    %338 = arith.mulf %337, %336 : vector<2x64xf32>
    %cst_148 = arith.constant 1.000000e+00 : f32
    %339 = vector.broadcast %cst_148 : f32 to vector<2x64xf32>
    %340 = arith.addf %339, %338 : vector<2x64xf32>
    %cst_149 = arith.constant 1.000000e+00 : f32
    %341 = vector.broadcast %cst_149 : f32 to vector<2x64xf32>
    %342 = arith.divf %341, %340 : vector<2x64xf32>
    %cst_150 = arith.constant 1.06140542 : f32
    %343 = vector.broadcast %cst_150 : f32 to vector<2x64xf32>
    %344 = arith.mulf %343, %342 : vector<2x64xf32>
    %cst_151 = arith.constant -1.45315206 : f32
    %345 = vector.broadcast %cst_151 : f32 to vector<2x64xf32>
    %346 = arith.addf %344, %345 : vector<2x64xf32>
    %347 = arith.mulf %346, %342 : vector<2x64xf32>
    %cst_152 = arith.constant 1.42141378 : f32
    %348 = vector.broadcast %cst_152 : f32 to vector<2x64xf32>
    %349 = arith.addf %347, %348 : vector<2x64xf32>
    %350 = arith.mulf %349, %342 : vector<2x64xf32>
    %cst_153 = arith.constant -0.284496725 : f32
    %351 = vector.broadcast %cst_153 : f32 to vector<2x64xf32>
    %352 = arith.addf %350, %351 : vector<2x64xf32>
    %353 = arith.mulf %352, %342 : vector<2x64xf32>
    %cst_154 = arith.constant 0.254829586 : f32
    %354 = vector.broadcast %cst_154 : f32 to vector<2x64xf32>
    %355 = arith.addf %353, %354 : vector<2x64xf32>
    %356 = arith.mulf %355, %342 : vector<2x64xf32>
    %cst_155 = arith.constant 0.000000e+00 : f32
    %357 = vector.broadcast %cst_155 : f32 to vector<2x64xf32>
    %358 = arith.subf %357, %336 : vector<2x64xf32>
    %359 = arith.mulf %358, %336 : vector<2x64xf32>
    %360 = math.exp %359 : vector<2x64xf32>
    %361 = arith.mulf %356, %360 : vector<2x64xf32>
    %cst_156 = arith.constant 1.000000e+00 : f32
    %362 = vector.broadcast %cst_156 : f32 to vector<2x64xf32>
    %363 = arith.subf %362, %361 : vector<2x64xf32>
    %364 = arith.mulf %335, %363 : vector<2x64xf32>
    %cst_157 = arith.constant 1.000000e+00 : f32
    %365 = vector.broadcast %cst_157 : f32 to vector<2x64xf32>
    %366 = arith.addf %365, %364 : vector<2x64xf32>
    %367 = arith.mulf %328, %366 : vector<2x64xf32>
    %368 = tpu.concatenate %367, %307 in 1 : vector<2x64xf32>, vector<2x32xf32> -> vector<2x96xf32>
    %cst_158 = arith.constant dense<0.000000e+00> : vector<2x96xf32>
    %369 = tpu.matmul %368, %225, %cst_158 {dimension_numbers = #tpu.dot_dimension_numbers<[1], [0], [0], [1], [0, 0, 1, 1], [], []>} : vector<2x96xf32>, vector<96x96xf32>, vector<2x96xf32> -> vector<2x96xf32>
    %370 = vector.broadcast %233 : vector<1x96xf32> to vector<2x96xf32>
    %371 = arith.addf %369, %370 : vector<2x96xf32>
    %372 = vector.extract_strided_slice %371 {offsets = [0, 0], sizes = [2, 32], strides = [1, 1]} : vector<2x96xf32> to vector<2x32xf32>
    %cst_159 = arith.constant 5.000000e-01 : f32
    %373 = vector.broadcast %cst_159 : f32 to vector<2x32xf32>
    %374 = arith.mulf %373, %372 : vector<2x32xf32>
    %375 = math.tanh %374 : vector<2x32xf32>
    %cst_160 = arith.constant 1.000000e+00 : f32
    %376 = vector.broadcast %cst_160 : f32 to vector<2x32xf32>
    %377 = arith.addf %375, %376 : vector<2x32xf32>
    %cst_161 = arith.constant 5.000000e-01 : f32
    %378 = vector.broadcast %cst_161 : f32 to vector<2x32xf32>
    %379 = arith.mulf %378, %377 : vector<2x32xf32>
    %380 = vector.extract_strided_slice %371 {offsets = [0, 32], sizes = [2, 32], strides = [1, 1]} : vector<2x96xf32> to vector<2x32xf32>
    %cst_162 = arith.constant 5.000000e-01 : f32
    %381 = vector.broadcast %cst_162 : f32 to vector<2x32xf32>
    %382 = arith.mulf %381, %380 : vector<2x32xf32>
    %383 = math.tanh %382 : vector<2x32xf32>
    %cst_163 = arith.constant 1.000000e+00 : f32
    %384 = vector.broadcast %cst_163 : f32 to vector<2x32xf32>
    %385 = arith.addf %383, %384 : vector<2x32xf32>
    %cst_164 = arith.constant 5.000000e-01 : f32
    %386 = vector.broadcast %cst_164 : f32 to vector<2x32xf32>
    %387 = arith.mulf %386, %385 : vector<2x32xf32>
    %388 = vector.extract_strided_slice %371 {offsets = [0, 64], sizes = [2, 32], strides = [1, 1]} : vector<2x96xf32> to vector<2x32xf32>
    %389 = arith.mulf %307, %379 : vector<2x32xf32>
    %cst_165 = arith.constant dense<0.000000e+00> : vector<2x32xf32>
    %390 = tpu.matmul %389, %223, %cst_165 {dimension_numbers = #tpu.dot_dimension_numbers<[1], [0], [0], [1], [0, 0, 1, 1], [], []>} : vector<2x32xf32>, vector<32x32xf32>, vector<2x32xf32> -> vector<2x32xf32>
    %391 = arith.addf %388, %390 : vector<2x32xf32>
    %392 = math.tanh %391 : vector<2x32xf32>
    %cst_166 = arith.constant 1.000000e+00 : f32
    %393 = vector.broadcast %cst_166 : f32 to vector<2x32xf32>
    %394 = arith.subf %393, %387 : vector<2x32xf32>
    %395 = arith.mulf %394, %307 : vector<2x32xf32>
    %396 = arith.mulf %387, %392 : vector<2x32xf32>
    %397 = arith.addf %395, %396 : vector<2x32xf32>
    %cst_167 = arith.constant dense<0.000000e+00> : vector<2xf32>
    %398 = vector.multi_reduction <add>, %397, %cst_167 [1] : vector<2x32xf32> to vector<2xf32>
    %399 = vector.shape_cast %398 : vector<2xf32> to vector<2x1xf32>
    %cst_168 = arith.constant 3.200000e+01 : f32
    %400 = vector.broadcast %cst_168 : f32 to vector<2x1xf32>
    %401 = arith.divf %399, %400 : vector<2x1xf32>
    %402 = vector.broadcast %401 : vector<2x1xf32> to vector<2x32xf32>
    %403 = arith.subf %397, %402 : vector<2x32xf32>
    %404 = arith.mulf %403, %403 : vector<2x32xf32>
    %cst_169 = arith.constant dense<0.000000e+00> : vector<2xf32>
    %405 = vector.multi_reduction <add>, %404, %cst_169 [1] : vector<2x32xf32> to vector<2xf32>
    %406 = vector.shape_cast %405 : vector<2xf32> to vector<2x1xf32>
    %cst_170 = arith.constant 3.200000e+01 : f32
    %407 = vector.broadcast %cst_170 : f32 to vector<2x1xf32>
    %408 = arith.divf %406, %407 : vector<2x1xf32>
    %cst_171 = arith.constant 9.99999974E-6 : f32
    %409 = vector.broadcast %cst_171 : f32 to vector<2x1xf32>
    %410 = arith.addf %408, %409 : vector<2x1xf32>
    %411 = math.rsqrt %410 : vector<2x1xf32>
    %412 = vector.broadcast %411 : vector<2x1xf32> to vector<2x32xf32>
    %413 = arith.mulf %403, %412 : vector<2x32xf32>
    %c88_172 = arith.constant 88 : index
    %c32_173 = arith.constant 32 : index
    %414 = vector.load %arg1[%c88_172, %c32_173] : memref<152x128xf32, #tpu.memory_space<vmem>>, vector<32x32xf32>
    %cst_174 = arith.constant dense<0.000000e+00> : vector<2x32xf32>
    %415 = tpu.matmul %413, %414, %cst_174 {dimension_numbers = #tpu.dot_dimension_numbers<[1], [0], [0], [1], [0, 0, 1, 1], [], []>} : vector<2x32xf32>, vector<32x32xf32>, vector<2x32xf32> -> vector<2x32xf32>
    %c81 = arith.constant 81 : index
    %c0_175 = arith.constant 0 : index
    %416 = vector.load %arg1[%c81, %c0_175] : memref<152x128xf32, #tpu.memory_space<vmem>>, vector<1x32xf32>
    %417 = vector.broadcast %416 : vector<1x32xf32> to vector<2x32xf32>
    %418 = arith.addf %415, %417 : vector<2x32xf32>
    %cst_176 = arith.constant 5.000000e-01 : f32
    %419 = vector.broadcast %cst_176 : f32 to vector<2x32xf32>
    %420 = arith.mulf %419, %418 : vector<2x32xf32>
    %cst_177 = arith.constant 0.707106769 : f32
    %421 = vector.broadcast %cst_177 : f32 to vector<2x32xf32>
    %422 = arith.mulf %418, %421 : vector<2x32xf32>
    %cst_178 = arith.constant 0.000000e+00 : f32
    %423 = vector.broadcast %cst_178 : f32 to vector<2x32xf32>
    %424 = arith.cmpf olt, %422, %423 : vector<2x32xf32>
    %cst_179 = arith.constant -1.000000e+00 : f32
    %cst_180 = arith.constant 1.000000e+00 : f32
    %425 = vector.broadcast %cst_179 : f32 to vector<2x32xf32>
    %426 = vector.broadcast %cst_180 : f32 to vector<2x32xf32>
    %427 = arith.select %424, %425, %426 : vector<2x32xi1>, vector<2x32xf32>
    %428 = math.absf %422 : vector<2x32xf32>
    %cst_181 = arith.constant 0.327591091 : f32
    %429 = vector.broadcast %cst_181 : f32 to vector<2x32xf32>
    %430 = arith.mulf %429, %428 : vector<2x32xf32>
    %cst_182 = arith.constant 1.000000e+00 : f32
    %431 = vector.broadcast %cst_182 : f32 to vector<2x32xf32>
    %432 = arith.addf %431, %430 : vector<2x32xf32>
    %cst_183 = arith.constant 1.000000e+00 : f32
    %433 = vector.broadcast %cst_183 : f32 to vector<2x32xf32>
    %434 = arith.divf %433, %432 : vector<2x32xf32>
    %cst_184 = arith.constant 1.06140542 : f32
    %435 = vector.broadcast %cst_184 : f32 to vector<2x32xf32>
    %436 = arith.mulf %435, %434 : vector<2x32xf32>
    %cst_185 = arith.constant -1.45315206 : f32
    %437 = vector.broadcast %cst_185 : f32 to vector<2x32xf32>
    %438 = arith.addf %436, %437 : vector<2x32xf32>
    %439 = arith.mulf %438, %434 : vector<2x32xf32>
    %cst_186 = arith.constant 1.42141378 : f32
    %440 = vector.broadcast %cst_186 : f32 to vector<2x32xf32>
    %441 = arith.addf %439, %440 : vector<2x32xf32>
    %442 = arith.mulf %441, %434 : vector<2x32xf32>
    %cst_187 = arith.constant -0.284496725 : f32
    %443 = vector.broadcast %cst_187 : f32 to vector<2x32xf32>
    %444 = arith.addf %442, %443 : vector<2x32xf32>
    %445 = arith.mulf %444, %434 : vector<2x32xf32>
    %cst_188 = arith.constant 0.254829586 : f32
    %446 = vector.broadcast %cst_188 : f32 to vector<2x32xf32>
    %447 = arith.addf %445, %446 : vector<2x32xf32>
    %448 = arith.mulf %447, %434 : vector<2x32xf32>
    %cst_189 = arith.constant 0.000000e+00 : f32
    %449 = vector.broadcast %cst_189 : f32 to vector<2x32xf32>
    %450 = arith.subf %449, %428 : vector<2x32xf32>
    %451 = arith.mulf %450, %428 : vector<2x32xf32>
    %452 = math.exp %451 : vector<2x32xf32>
    %453 = arith.mulf %448, %452 : vector<2x32xf32>
    %cst_190 = arith.constant 1.000000e+00 : f32
    %454 = vector.broadcast %cst_190 : f32 to vector<2x32xf32>
    %455 = arith.subf %454, %453 : vector<2x32xf32>
    %456 = arith.mulf %427, %455 : vector<2x32xf32>
    %cst_191 = arith.constant 1.000000e+00 : f32
    %457 = vector.broadcast %cst_191 : f32 to vector<2x32xf32>
    %458 = arith.addf %457, %456 : vector<2x32xf32>
    %459 = arith.mulf %420, %458 : vector<2x32xf32>
    %c120 = arith.constant 120 : index
    %c0_192 = arith.constant 0 : index
    %460 = vector.load %arg1[%c120, %c0_192] : memref<152x128xf32, #tpu.memory_space<vmem>>, vector<32x128xf32>
    %cst_193 = arith.constant dense<0.000000e+00> : vector<2x128xf32>
    %461 = tpu.matmul %459, %460, %cst_193 {dimension_numbers = #tpu.dot_dimension_numbers<[1], [0], [0], [1], [0, 0, 1, 1], [], []>} : vector<2x32xf32>, vector<32x128xf32>, vector<2x128xf32> -> vector<2x128xf32>
    %c82 = arith.constant 82 : index
    %c0_194 = arith.constant 0 : index
    %462 = vector.load %arg1[%c82, %c0_194] : memref<152x128xf32, #tpu.memory_space<vmem>>, vector<1x128xf32>
    %463 = vector.broadcast %462 : vector<1x128xf32> to vector<2x128xf32>
    %464 = arith.addf %461, %463 : vector<2x128xf32>
    %465 = math.tanh %464 : vector<2x128xf32>
    %c0_195 = arith.constant 0 : index
    %c0_196 = arith.constant 0 : index
    %466 = vector.load %arg3[%c0_195, %c0_196] : memref<2x128xf32, #tpu.memory_space<vmem>>, vector<2x128xf32>
    tpu.vector_store %arg3[%c0_195, %c0_196], %465 {strides = array<i32>} : memref<2x128xf32, #tpu.memory_space<vmem>>, vector<2x128xf32>,
    return
  }
}

</mosaic_0001>

<bundles_post_ra>
// kernel: actor_forward_pallas.1
= control target key start
LH: loop header
LB: loop body
LE: loop exit
PB: predicated region body
PF: predicated region fallthrough
CT: control target
= control target key end

     0   :  { %8 = vsyncpa [#allocation3], 0  ;;  %s1908_s0 = inlined_call_operand.vmem [shape: f32[32,16], index: 0, kind: input, shape index: {}]   ;;  %s1909_s1 = inlined_call_operand.hbm [shape: f32[152,128], index: 1, kind: input, shape index: {}]   ;;  %s1910_s2 = inlined_call_operand.hbm [shape: f32[2,200,128], index: 2, kind: input, shape index: {}]   ;;  %s1911_s3 = inlined_call_operand.hbm [shape: f32[2,128], index: 3, kind: output, shape index: {}]  }
   0x1   :  { %9 = vsyncpa [#allocation6], 0 }
   0x2   :  { %10 = vsyncpa [#allocation4], 0  ;;  %s17_s14 = sshll.u32 %s1909_s1, 4  ;;  %s1575_s15 = smov [#allocation2]   ;;  %s18_s14 = int_to_ptr.hbm [resolvable:$true] %s17_s14 }
   0x3   :  { %s19_s16 = sshll.u32 %s1575_s15, 4  ;;  %s30_s19 = sshll.u32 %s1910_s2, 4  ;;  %s20_s16 = int_to_ptr.vmem [resolvable:$true] %s19_s16  ;;  %s31_s19 = int_to_ptr.hbm [resolvable:$true] %s30_s19 }
   0x4   :  { %s1576_s20 = smov 128   ;;  %s1577_s21 = smov 8  }
   0x5   :  { %25 = dma.hbm_to_vmem [thread:$0]  %s18_s14, 2432, %s20_s16, [#allocation3], %s1576_s20, %s1576_s20, %s1577_s21  }
   0x6   :  { %s1578_s22 = smov [#allocation5]  }
   0x7   :  { %s32_s23 = sshll.u32 %s1578_s22, 4  ;;  %s33_s23 = int_to_ptr.vmem [resolvable:$true] %s32_s23 }
   0x8   :  { %38 = dma.hbm_to_vmem [thread:$0]  %s31_s19, 6400, %s33_s23, [#allocation6], %s1576_s20, %s1576_s20, %s1577_s21  }
   0x9   :  { %1569 = dma.done.wait [#allocation3], 2432  }
   0xa   :  { %1570 = vsyncadd [#allocation3], 4294964864 }
   0xb   :  { %1571 = dma.done.wait [#allocation6], 6400  }
   0xc   :  { %1572 = vsyncadd [#allocation6], 4294960896  ;;  %v52_v0 = vld [vmem:[#allocation2 + $0x8] sm:$0xff]  ;;  %v51_v1 = vld [vmem:[#allocation2] sm:$0xff]  ;;  %vm57_vm0 = vcmask 130048   ;;  %vm217_vm1 = vcmask 254976  }
   0xd   :  { %84 = vmatpush.msra.mxu0 %v52_v0  ;;  %v47_v2 = vld [vmem:[%s1908_s0] sm:$0xff]  ;;  %1338 = vmatpush.msra.mxu2 %v52_v0  ;;  %v48_v3 = vld [vmem:[%s1908_s0 + $0x8] sm:$0xff]  ;;  %v49_v4 = vld [vmem:[%s1908_s0 + $0x10] sm:$0xff]  ;;  %vm99_vm2 = vcmask 261120   ;;  %v1579_v17 = vmov 32.0   ;;  %s1582_s30 = smov 32  }
   0xe   :  { %v53_v5 = vld [vmem:[#allocation2 + $0x10] sm:$0xff]  ;;  %v54_v9 = vld [vmem:[#allocation2 + $0x18] sm:$0xff]  ;;  %v55_v13 = vld [vmem:[#allocation2 + $0x20] sm:$0xff]  ;;  %1431 = vrcp.f32 %v1579_v17  ;;  %vm372_vm13 = vcmask 1041409   ;;  %vm381_vm14 = vcmask 523264   ;;  %s1583_s4 = smov 64  }
   0xf   :  { %85 = vmatpush.msra.mxu0 %v51_v1  ;;  %1339 = vmatpush.msra.mxu2 %v51_v1  ;;  %v50_v39 = vld [vmem:[%s1908_s0 + $0x18] sm:$0xff]  ;;  %v1651_v40 = vld [vmem:[#allocation5 + $0x18] sm:$0xff]  ;;  %v1654_v41 = vld [vmem:[#allocation5 + $0x10] sm:$0xff]  ;;  %s1581_s0 = smov 96   ;;  %s1585_s5 = smov [#allocation7]  }
  0x10   :  { %1314 = vmatmul.msk.f32.vlgmr.msra.gmra.mxu0 %vm57_vm0, %v47_v2  ;;  %1317 = vmatmul.msk.f32.vlgmr.msra.gmra.mxu2 %vm57_vm0, %v50_v39  ;;  %v1657_v42 = vld [vmem:[#allocation5 + $0x8] sm:$0xff]  ;;  %v1660_v43 = vld [vmem:[#allocation5] sm:$0xff]  ;;  %v154_v44 = vld [vmem:[#allocation2 + $0x48] sm:$0xff]  ;;  %s1301_s6 = sshll.u32 %s1585_s5, 4  ;;  %s1303_s9 = sshll.u32 %s1911_s3, 4  ;;  %s1302_s6 = int_to_ptr.vmem [resolvable:$true] %s1301_s6  ;;  %s1304_s9 = int_to_ptr.hbm [resolvable:$true] %s1303_s9 }
  0x11   :  { %256 = vmatpush.msrb.mxu2 %v1651_v40  ;;  %175 = vmatpush.msra.mxu1 %v154_v44  ;;  %v153_v45 = vld [vmem:[#allocation2 + $0x40] sm:$0xff]  ;;  %v152_v46 = vld [vmem:[#allocation2 + $0x38] sm:$0xff]  ;;  %v151_v47 = vld [vmem:[#allocation2 + $0x30] sm:$0xff] }
  0x13   :  { %257 = vmatpush.msrb.mxu2 %v1654_v41  ;;  %176 = vmatpush.msra.mxu1 %v153_v45 }
  0x14   :  { %v1432_v18 = vpop.eup %1431 }
  0x15   :  { %v107_v19 = vmul.f32 32.0, %v1432_v18  ;;  %vm111_vm3 = vweird.f32 %v1432_v18  ;;  %258 = vmatpush.msrb.mxu2 %v1657_v42  ;;  %177 = vmatpush.msra.mxu1 %v152_v46 }
  0x17   :  { %v108_v20 = vsub.f32 1.0, %v107_v19  ;;  %259 = vmatpush.msrb.mxu2 %v1660_v43  ;;  %178 = vmatpush.msra.mxu1 %v151_v47  ;;  %v56_v19 = vld [vmem:[#allocation2 + $0x28] sm:$0xff] }
  0x18   :  { %1315 = vmatmul.msk.f32.gmra.mxu0 %vm57_vm0, %v48_v3 }
  0x19   :  { %v109_v21 = vmul.f32 %v1432_v18, %v108_v20 }
  0x1b   :  { %v110_v22 = vadd.f32 %v1432_v18, %v109_v21 }
  0x1d   :  { %v1630_v23 = vsel %vm111_vm3, %v1432_v18, %v110_v22  ;;  %v1580_v18 = vmov 32   ;;  %v189_v22 = vld [vmem:[#allocation2 + $0x70] sm:$0xff] }
  0x1e   :  { %1351 = vset.pattern.permute.xlu0 %v1580_v18  ;;  %290 = vmatpush.msra.mxu3 %v189_v22 }
  0x1f   :  { %783 = vmatpush.msrb.mxu0 %v189_v22 }
  0x20   :  { %1316 = vmatmul.msk.f32.gmra.mxu0 %vm57_vm0, %v49_v4 }
  0x8d   :  { %v87_v6 = vpop.f32.mrf.mxu0 }
  0x8e   :  { %v1624_v7 = vadd.f32 %v87_v6, %v53_v5 }
  0x90   :  { %v218_v8 = vsel %vm217_vm1, %v1624_v7, 0.0 }
  0x91   :  { %219 = vadd.xlane.f32.xlu0 %v218_v8 }
  0x93   :  { %v96_v20 = vpop.f32.mrf.mxu2 }
  0x94   :  { %v97_v21 = vadd.f32 %v96_v20, %v56_v19 }
  0x95   :  { %v90_v10 = vpop.f32.mrf.mxu0 }
  0x96   :  { %v91_v11 = vadd.f32 %v90_v10, %v54_v9 }
  0x98   :  { %v100_v12 = vsel %vm99_vm2, %v91_v11, 0.0 }
  0x99   :  { %101 = vadd.xlane.f32.xlu0 %v100_v12 }
  0x9d   :  { %v93_v14 = vpop.f32.mrf.mxu0 }
  0x9e   :  { %v94_v15 = vadd.f32 %v93_v14, %v55_v13 }
  0xa0   :  { %v103_v16 = vsel %vm99_vm2, %v94_v15, 0.0 }
  0xa1   :  { %104 = vadd.xlane.f32.xlu1 %v103_v16 }
  0xad   :  { %303 = vperm.xlu0 %1351, %v97_v21  }
 0x104   :  { %v220_v24 = vpop.xlane.xlu0 %219 }
 0x105   :  { %v221_v25 = vmul.f32 %v220_v24, %v1630_v23  ;;  %v188_v24 = vld [vmem:[#allocation2 + $0x68] sm:$0xff] }
 0x106   :  { %291 = vmatpush.msra.mxu3 %v188_v24  ;;  %784 = vmatpush.msrb.mxu0 %v188_v24 }
 0x107   :  { %v222_v26 = vsub.f32 %v1624_v7, %v221_v25  ;;  %v187_v25 = vld [vmem:[#allocation2 + $0x60] sm:$0xff] }
 0x108   :  { %292 = vmatpush.msra.mxu3 %v187_v25  ;;  %785 = vmatpush.msrb.mxu0 %v187_v25 }
 0x109   :  { %v223_v27 = vmul.f32 %v222_v26, %v222_v26 }
 0x10b   :  { %v224_v28 = vsel %vm217_vm1, %v223_v27, 0.0  ;;  %v1671_v27 = vld [vmem:[#allocation5 + $0xc0] ss:$0 sm:$0xff] }
 0x10c   :  { %225 = vadd.xlane.f32.xlu1 %v224_v28  ;;  %v102_v29 = vpop.xlane.xlu0 %101  ;;  %v1423_v28 = vld [vmem:[#allocation2 + $0x50] ss:$0 sm:$0xff] }
 0x10d   :  { %v113_v30 = vmul.f32 %v1630_v23, %v102_v29 }
 0x10f   :  { %v1636_v31 = vsub.f32 %v91_v11, %v113_v30 }
 0x111   :  { %v117_v32 = vmul.f32 %v1636_v31, %v1636_v31 }
 0x113   :  { %v119_v33 = vsel %vm99_vm2, %v117_v32, 0.0 }
 0x114   :  { %v105_v34 = vpop.xlane.xlu1 %104  ;;  %120 = vadd.xlane.f32.xlu2 %v119_v33 }
 0x115   :  { %v114_v35 = vmul.f32 %v1630_v23, %v105_v34 }
 0x117   :  { %v1642_v36 = vsub.f32 %v94_v15, %v114_v35 }
 0x119   :  { %v118_v37 = vmul.f32 %v1642_v36, %v1642_v36 }
 0x11b   :  { %v122_v38 = vsel %vm99_vm2, %v118_v37, 0.0 }
 0x11c   :  { %123 = vadd.xlane.f32.xlu2 %v122_v38 }
 0x11f   :  { %v1688_v44 = vpop.permute.xlu0 %303 }
 0x17f   :  { %v226_v48 = vpop.xlane.xlu1 %225 }
 0x180   :  { %v227_v49 = vmul.f32 %v226_v48, %v1630_v23 }
 0x182   :  { %v228_v50 = vadd.f32 1e-05, %v227_v49 }
 0x184   :  { %1433 = vrsqrt.f32 %v228_v50  ;;  %vm235_vm5 = vweird.f32 %v228_v50 }
 0x187   :  { %v121_v51 = vpop.xlane.xlu2 %120 }
 0x188   :  { %v125_v52 = vmul.f32 %v121_v51, %v1630_v23 }
 0x18a   :  { %v1434_v53 = vpop.eup %1433  ;;  %v127_v54 = vadd.f32 1e-05, %v125_v52 }
 0x18b   :  { %v230_v55 = vmul.f32 %v1434_v53, %v228_v50  ;;  %vm236_vm4 = vweird.f32 %v1434_v53 }
 0x18c   :  { %1435 = vrsqrt.f32 %v127_v54  ;;  %vm237_vm6 = vmor %vm235_vm5, %vm236_vm4  ;;  %vm135_vm8 = vweird.f32 %v127_v54 }
 0x18d   :  { %v231_v56 = vmul.f32 %v1434_v53, %v230_v55 }
 0x18f   :  { %v232_v57 = vmul.f32 0.5, %v231_v56  ;;  %v124_v58 = vpop.xlane.xlu2 %123 }
 0x190   :  { %v126_v59 = vmul.f32 %v124_v58, %v1630_v23 }
 0x191   :  { %v233_v60 = vsub.f32 1.5, %v232_v57 }
 0x192   :  { %v1436_v61 = vpop.eup %1435  ;;  %v128_v62 = vadd.f32 1e-05, %v126_v59 }
 0x193   :  { %v234_v63 = vmul.f32 %v1434_v53, %v233_v60  ;;  %v130_v0 = vmul.f32 %v1436_v61, %v127_v54  ;;  %vm136_vm7 = vweird.f32 %v1436_v61 }
 0x194   :  { %1437 = vrsqrt.f32 %v128_v62  ;;  %vm137_vm9 = vmor %vm135_vm8, %vm136_vm7  ;;  %vm145_vm11 = vweird.f32 %v128_v62 }
 0x195   :  { %v131_v1 = vmul.f32 %v1436_v61, %v130_v0  ;;  %v238_v2 = vsel %vm237_vm6, %v1434_v53, %v234_v63 }
 0x196   :  { %v239_v3 = vmul.f32 %v238_v2, %v222_v26  ;;  %v186_v26 = vld [vmem:[#allocation2 + $0x58] sm:$0xff] }
 0x197   :  { %v132_v4 = vmul.f32 0.5, %v131_v1  ;;  %293 = vmatpush.msra.mxu3 %v186_v26  ;;  %786 = vmatpush.msrb.mxu0 %v186_v26 }
 0x198   :  { %1320 = vmatmul.msk.f32.vlgmr.msrb.gmra.mxu2 %vm99_vm2, %v239_v3 }
 0x199   :  { %v133_v5 = vsub.f32 1.5, %v132_v4  ;;  %v201_v4 = vld [vmem:[#allocation5 + $0x58] sm:$0xff] }
 0x19a   :  { %v1438_v6 = vpop.eup %1437  ;;  %393 = vmatpush.msrb.mxu1 %v201_v4  ;;  %v1424_v4 = vld [vmem:[#allocation5 + $0xc1] ss:$0 sm:$0xff] }
 0x19b   :  { %v140_v8 = vmul.f32 %v1438_v6, %v128_v62  ;;  %v134_v9 = vmul.f32 %v1436_v61, %v133_v5  ;;  %vm146_vm10 = vweird.f32 %v1438_v6 }
 0x19c   :  { %vm147_vm12 = vmor %vm145_vm11, %vm146_vm10 }
 0x19d   :  { %v141_v10 = vmul.f32 %v1438_v6, %v140_v8  ;;  %v138_v11 = vsel %vm137_vm9, %v1436_v61, %v134_v9  ;;  %v200_v8 = vld [vmem:[#allocation5 + $0x50] sm:$0xff]  ;;  %v199_v9 = vld [vmem:[#allocation5 + $0x48] sm:$0xff]  ;;  %vm579_vm9 = vcmask 785408  }
 0x19e   :  { %v149_v12 = vmul.f32 %v138_v11, %v1636_v31  ;;  %394 = vmatpush.msrb.mxu1 %v200_v8  ;;  %v1697_v11 = vld [vmem:[#allocation5 + $0x30] sm:$0xff] }
 0x19f   :  { %v142_v13 = vmul.f32 0.5, %v141_v10  ;;  %v1695_v10 = vld [vmem:[#allocation5 + $0x38] sm:$0xff] }
 0x1a0   :  { %1318 = vmatmul.msk.f32.vlgmr.msra.gmra.mxu1 %vm99_vm2, %v149_v12 }
 0x1a1   :  { %v143_v14 = vsub.f32 1.5, %v142_v13  ;;  %v198_v13 = vld [vmem:[#allocation5 + $0x40] sm:$0xff]  ;;  %395 = vmatpush.msrb.mxu1 %v199_v9 }
 0x1a3   :  { %v144_v15 = vmul.f32 %v1438_v6, %v143_v14  ;;  %v1372_v14 = vpack.i.bf16 %v1697_v11, %v1695_v10  ;;  %396 = vmatpush.msrb.mxu1 %v198_v13 }
 0x1a5   :  { %v148_v16 = vsel %vm147_vm12, %v1438_v6, %v144_v15  ;;  %v1701_v15 = vld [vmem:[#allocation5 + $0x28] sm:$0xff]  ;;  %397 = vmatpush.msrb.mxu1 %v1695_v10 }
 0x1a6   :  { %v150_v17 = vmul.f32 %v148_v16, %v1642_v36  ;;  %v1703_v16 = vld [vmem:[#allocation5 + $0x20] sm:$0xff] }
 0x1a7   :  { %398 = vmatpush.msrb.mxu1 %v1697_v11 }
 0x1a8   :  { %1319 = vmatmul.msk.f32.gmra.mxu1 %vm99_vm2, %v150_v17  ;;  %v1377_v17 = vpack.i.bf16 %v1703_v16, %v1701_v15 }
 0x1a9   :  { %399 = vmatpush.msrb.mxu1 %v1701_v15 }
 0x1ab   :  { %400 = vmatpush.msrb.mxu1 %v1703_v16 }
 0x21b   :  { %v261_v29 = vpop.f32.mrf.mxu2 }
 0x21c   :  { %v262_v30 = vadd.f32 %v1671_v27, %v261_v29 }
 0x21d   :  { %v180_v31 = vpop.f32.mrf.mxu1 }
 0x21e   :  { %v266_v32 = vperm.slane %v262_v30, 0  ;;  %v1674_v33 = vadd.f32 %v1423_v28, %v180_v31  ;;  %v265_v35 = vrot.slane %v262_v30, 1  ;;  %v1714_v30 = vpack.i.bf16 %v1654_v41, %v1651_v40 }
 0x21f   :  { %v1718_v31 = vpack.i.bf16 %v1660_v43, %v1657_v42 }
 0x220   :  { %348 = vrot.lane.b32.xlu1 %v1674_v33, %s1581_s0  ;;  %v270_v34 = vmul.f32 %v266_v32, %v1674_v33  ;;  %v267_v37 = vperm.slane %v265_v35, 0 }
 0x222   :  { %1321 = vmatmul.msk.f32.vlgmr.msra.gmra.mxu3 %vm99_vm2, %v270_v34 }
 0x225   :  { %v183_v36 = vpop.f32.mrf.mxu1 }
 0x226   :  { %v1680_v38 = vadd.f32 %v1423_v28, %v183_v36 }
 0x228   :  { %350 = vrot.lane.b32.xlu2 %v1680_v38, %s1581_s0  ;;  %v271_v39 = vmul.f32 %v267_v37, %v1680_v38  ;;  %1353 = vrot.lane.b32.xlu1 %v1714_v30, %s1582_s30 }
 0x22a   :  { %1322 = vmatmul.msk.f32.gmra.mxu3 %vm99_vm2, %v271_v39 }
 0x230   :  { %376 = vrot.lane.b32.xlu2 %v1624_v7, %s1582_s30 }
 0x238   :  { %1358 = vrot.lane.b32.xlu2 %v1718_v31, %s1582_s30 }
 0x282   :  { %v351_v43 = vpop.permute.xlu2 %350 }
 0x292   :  { %v349_v37 = vpop.permute.xlu1 %348 }
 0x2a5   :  { %v295_v45 = vpop.f32.mrf.mxu3 }
 0x2a6   :  { %v306_v46 = vadd.f32 %v1688_v44, %v295_v45 }
 0x2a8   :  { %v308_v47 = vsel %vm99_vm2, %v306_v46, -inf }
 0x2a9   :  { %v309_v48 = vrot.slane %v308_v47, 4 }
 0x2ab   :  { %v310_v49 = vmax.f32 %v308_v47, %v309_v48 }
 0x2ad   :  { %v311_v50 = vrot.slane %v310_v49, 2  ;;  %v298_v51 = vpop.f32.mrf.mxu3 }
 0x2ae   :  { %v307_v52 = vadd.f32 %v1688_v44, %v298_v51 }
 0x2af   :  { %v312_v53 = vmax.f32 %v310_v49, %v311_v50 }
 0x2b0   :  { %v315_v54 = vsel %vm99_vm2, %v307_v52, -inf }
 0x2b1   :  { %v313_v55 = vrot.slane %v312_v53, 1  ;;  %v316_v56 = vrot.slane %v315_v54, 4 }
 0x2b3   :  { %v314_v57 = vmax.f32 %v312_v53, %v313_v55  ;;  %v317_v58 = vmax.f32 %v315_v54, %v316_v56 }
 0x2b5   :  { %v322_v59 = vsub.f32 %v306_v46, %v314_v57  ;;  %v318_v60 = vrot.slane %v317_v58, 2 }
 0x2b7   :  { %v324_v61 = vmul.f32 1.442695, %v322_v59  ;;  %v319_v62 = vmax.f32 %v317_v58, %v318_v60  ;;  %v377_v59 = vpop.permute.xlu2 %376 }
 0x2b9   :  { %1439 = vpow2.f32 %v324_v61  ;;  %v320_v63 = vrot.slane %v319_v62, 1 }
 0x2bb   :  { %v321_v0 = vmax.f32 %v319_v62, %v320_v63  ;;  %v1354_v62 = vpop.permute.xlu1 %1353 }
 0x2bc   :  { %v1355_v63 = vunpack.i.l.bf16 %v1354_v62 }
 0x2bd   :  { %v323_v1 = vsub.f32 %v307_v52, %v321_v0  ;;  %v1356_v0 = vunpack.i.h.bf16 %v1354_v62 }
 0x2be   :  { %441 = vmatpush.msra.mxu2 %v1355_v63  ;;  %v210_v63 = vld [vmem:[#allocation5 + $0xa0] sm:$0xff] }
 0x2bf   :  { %v1440_v2 = vpop.eup %1439  ;;  %v326_v3 = vmul.f32 1.442695, %v323_v1  ;;  %v1359_v1 = vpop.permute.xlu2 %1358 }
 0x2c0   :  { %v328_v5 = vsel %vm99_vm2, %v1440_v2, 0.0  ;;  %442 = vmatpush.msra.mxu2 %v1356_v0 }
 0x2c1   :  { %v329_v6 = vrot.slane %v328_v5, 4  ;;  %1441 = vpow2.f32 %v326_v3  ;;  %v1361_v3 = vunpack.i.h.bf16 %v1359_v1 }
 0x2c3   :  { %v330_v12 = vadd.f32 %v329_v6, %v328_v5 }
 0x2c5   :  { %v331_v18 = vrot.slane %v330_v12, 2 }
 0x2c7   :  { %v1442_v19 = vpop.eup %1441  ;;  %v332_v20 = vadd.f32 %v331_v18, %v330_v12 }
 0x2c8   :  { %v335_v21 = vsel %vm99_vm2, %v1442_v19, 0.0 }
 0x2c9   :  { %v333_v22 = vrot.slane %v332_v20, 1  ;;  %v336_v24 = vrot.slane %v335_v21, 4 }
 0x2cb   :  { %v334_v25 = vadd.f32 %v333_v22, %v332_v20  ;;  %v337_v26 = vadd.f32 %v336_v24, %v335_v21 }
 0x2cd   :  { %1443 = vrcp.f32 %v334_v25  ;;  %v338_v28 = vrot.slane %v337_v26, 2 }
 0x2cf   :  { %v339_v29 = vadd.f32 %v338_v28, %v337_v26 }
 0x2d1   :  { %v340_v32 = vrot.slane %v339_v29, 1 }
 0x2d3   :  { %v1444_v34 = vpop.eup %1443  ;;  %v341_v35 = vadd.f32 %v340_v32, %v339_v29 }
 0x2d4   :  { %v344_v36 = vmul.f32 %v1444_v34, %v1440_v2  ;;  %v1360_v2 = vunpack.i.l.bf16 %v1359_v1  ;;  %v209_v1 = vld [vmem:[#allocation5 + $0x98] sm:$0xff] }
 0x2d5   :  { %1445 = vrcp.f32 %v341_v35 }
 0x2d6   :  { %v354_v39 = vmul.f32 %v349_v37, %v344_v36  ;;  %443 = vmatpush.msra.mxu2 %v1360_v2  ;;  %v208_v2 = vld [vmem:[#allocation5 + $0x90] sm:$0xff] }
 0x2d8   :  { %v356_v40 = vsel %vm99_vm2, %v354_v39, 0.0  ;;  %444 = vmatpush.msra.mxu2 %v1361_v3  ;;  %v207_v3 = vld [vmem:[#allocation5 + $0x88] sm:$0xff] }
 0x2d9   :  { %v357_v41 = vrot.slane %v356_v40, 4 }
 0x2db   :  { %v1446_v45 = vpop.eup %1445  ;;  %v358_v46 = vadd.f32 %v357_v41, %v356_v40 }
 0x2dc   :  { %v345_v42 = vmul.f32 %v1446_v45, %v1442_v19 }
 0x2dd   :  { %v359_v48 = vrot.slane %v358_v46, 2 }
 0x2de   :  { %v355_v47 = vmul.f32 %v351_v43, %v345_v42 }
 0x2df   :  { %v360_v51 = vadd.f32 %v359_v48, %v358_v46 }
 0x2e0   :  { %v363_v49 = vsel %vm99_vm2, %v355_v47, 0.0 }
 0x2e1   :  { %v364_v50 = vrot.slane %v363_v49, 4  ;;  %v361_v54 = vrot.slane %v360_v51, 1 }
 0x2e3   :  { %v365_v52 = vadd.f32 %v364_v50, %v363_v49  ;;  %v362_v57 = vadd.f32 %v361_v54, %v360_v51 }
 0x2e5   :  { %v366_v53 = vrot.slane %v365_v52, 2 }
 0x2e7   :  { %v367_v55 = vadd.f32 %v366_v53, %v365_v52 }
 0x2e9   :  { %v368_v56 = vrot.slane %v367_v55, 1 }
 0x2eb   :  { %v369_v58 = vadd.f32 %v368_v56, %v367_v55 }
 0x2ed   :  { %v373_v60 = vsel %vm372_vm13, %v369_v58, %v362_v57  ;;  %v213_v58 = vld [vmem:[#allocation5 + $0xb8] sm:$0xff] }
 0x2ee   :  { %v379_v61 = vsel %vm99_vm2, %v373_v60, %v377_v59  ;;  %587 = vmatpush.msrb.mxu3 %v213_v58 }
 0x2ef   :  { %1323 = vmatmul.msk.f32.vlgmr.msrb.gmra.mxu1 %vm381_vm14, %v379_v61  ;;  %v211_v61 = vld [vmem:[#allocation5 + $0xa8] sm:$0xff] }
 0x36c   :  { %v402_v5 = vpop.f32.mrf.mxu1 }
 0x36d   :  { %v403_v6 = vadd.f32 %v1424_v4, %v402_v5  ;;  %v206_v4 = vld [vmem:[#allocation5 + $0x80] sm:$0xff] }
 0x36f   :  { %v405_v8 = vmul.f32 0.5, %v403_v6 }
 0x371   :  { %1447 = vtanh.f32 %v405_v8  ;;  %v205_v8 = vld [vmem:[#allocation5 + $0x78] sm:$0xff] }
 0x377   :  { %v1448_v9 = vpop.eup %1447 }
 0x378   :  { %v407_v12 = vadd.f32 1.0, %v1448_v9 }
 0x37a   :  { %v408_v13 = vmul.f32 0.5, %v407_v12  ;;  %v204_v12 = vld [vmem:[#allocation5 + $0x70] sm:$0xff] }
 0x37c   :  { %v409_v18 = vmul.f32 %v408_v13, %v1624_v7  ;;  %v455_v24 = vsub.f32 1.0, %v408_v13 }
 0x37e   :  { %1324 = vmatmul.msk.f32.vlgmr.msra.gmra.mxu2 %vm99_vm2, %v409_v18  ;;  %v456_v26 = vmul.f32 %v455_v24, %v377_v59  ;;  %v212_v59 = vld [vmem:[#allocation5 + $0xb0] sm:$0xff] }
 0x37f   :  { %588 = vmatpush.msrb.mxu3 %v212_v59 }
 0x381   :  { %589 = vmatpush.msrb.mxu3 %v211_v61 }
 0x383   :  { %590 = vmatpush.msrb.mxu3 %v210_v63 }
 0x385   :  { %591 = vmatpush.msrb.mxu3 %v209_v1 }
 0x387   :  { %592 = vmatpush.msrb.mxu3 %v208_v2 }
 0x389   :  { %593 = vmatpush.msrb.mxu3 %v207_v3 }
 0x38b   :  { %594 = vmatpush.msrb.mxu3 %v206_v4 }
 0x38d   :  { %595 = vmatpush.msrb.mxu3 %v205_v8 }
 0x38f   :  { %596 = vmatpush.msrb.mxu3 %v204_v12 }
 0x401   :  { %v446_v19 = vpop.f32.mrf.mxu2 }
 0x402   :  { %450 = vrot.lane.b32.xlu1 %v446_v19, %s1583_s4 }
 0x474   :  { %v451_v20 = vpop.permute.xlu1 %450 }
 0x475   :  { %v453_v21 = vadd.f32 %v451_v20, %v403_v6  ;;  %v203_v20 = vld [vmem:[#allocation5 + $0x68] sm:$0xff] }
 0x476   :  { %597 = vmatpush.msrb.mxu3 %v203_v20 }
 0x477   :  { %1449 = vtanh.f32 %v453_v21  ;;  %v202_v21 = vld [vmem:[#allocation5 + $0x60] sm:$0xff] }
 0x478   :  { %598 = vmatpush.msrb.mxu3 %v202_v21 }
 0x47d   :  { %v1450_v22 = vpop.eup %1449 }
 0x47e   :  { %458 = vrot.lane.b32.xlu0 %v1450_v22, %s1581_s0 }
 0x4f0   :  { %v459_v25 = vpop.permute.xlu0 %458 }
 0x4f1   :  { %v461_v28 = vmul.f32 %v459_v25, %v408_v13 }
 0x4f3   :  { %v1733_v29 = vadd.f32 %v461_v28, %v456_v26 }
 0x4f5   :  { %464 = vrot.lane.b32.xlu2 %v1733_v29, %s1581_s0 }
 0x54f   :  { %v465_v7 = vpop.permute.xlu2 %464 }
 0x550   :  { %v467_v32 = vsel %vm217_vm1, %v465_v7, 0.0 }
 0x551   :  { %468 = vadd.xlane.f32.xlu1 %v467_v32 }
 0x56a   :  { %574 = vrot.lane.b32.xlu1 %v1733_v29, %s1582_s30 }
 0x5c4   :  { %v469_v34 = vpop.xlane.xlu1 %468 }
 0x5c5   :  { %v470_v35 = vmul.f32 %v469_v34, %v1630_v23 }
 0x5c7   :  { %v471_v36 = vsub.f32 %v1733_v29, %v470_v35 }
 0x5c9   :  { %v472_v37 = vmul.f32 %v471_v36, %v471_v36 }
 0x5cb   :  { %474 = vrot.lane.b32.xlu0 %v472_v37, %s1581_s0 }
 0x5d3   :  { %1363 = vrot.lane.b32.xlu0 %v1714_v30, %s1581_s0 }
 0x5db   :  { %1368 = vrot.lane.b32.xlu0 %v1718_v31, %s1581_s0 }
 0x63d   :  { %v475_v39 = vpop.permute.xlu0 %474 }
 0x63e   :  { %v477_v40 = vsel %vm217_vm1, %v475_v39, 0.0 }
 0x63f   :  { %478 = vadd.xlane.f32.xlu2 %v477_v40 }
 0x645   :  { %v1364_v30 = vpop.permute.xlu0 %1363 }
 0x646   :  { %v1366_v31 = vunpack.i.h.bf16 %v1364_v30  ;;  %v1365_v50 = vunpack.i.l.bf16 %v1364_v30 }
 0x648   :  { %526 = vmatpush.msrb.mxu2 %v1365_v50 }
 0x64a   :  { %527 = vmatpush.msrb.mxu2 %v1366_v31  ;;  %v575_v31 = vpop.permute.xlu1 %574 }
 0x64d   :  { %v1369_v51 = vpop.permute.xlu0 %1368 }
 0x64e   :  { %v1371_v52 = vunpack.i.h.bf16 %v1369_v51  ;;  %v1370_v53 = vunpack.i.l.bf16 %v1369_v51  ;;  %v1425_v51 = vld [vmem:[#allocation5 + $0xc2] ss:$0 sm:$0xff] }
 0x650   :  { %528 = vmatpush.msrb.mxu2 %v1370_v53 }
 0x652   :  { %529 = vmatpush.msrb.mxu2 %v1371_v52 }
 0x657   :  { %1373 = vrot.lane.b32.xlu2 %v1372_v14, %s1582_s30 }
 0x6b2   :  { %v479_v41 = vpop.xlane.xlu2 %478 }
 0x6b3   :  { %v480_v45 = vmul.f32 %v479_v41, %v1630_v23 }
 0x6b5   :  { %v481_v46 = vadd.f32 1e-05, %v480_v45 }
 0x6b7   :  { %1451 = vrsqrt.f32 %v481_v46  ;;  %vm488_vm0 = vweird.f32 %v481_v46 }
 0x6bd   :  { %v1452_v42 = vpop.eup %1451 }
 0x6be   :  { %v483_v43 = vmul.f32 %v1452_v42, %v481_v46  ;;  %vm489_vm15 = vweird.f32 %v1452_v42 }
 0x6bf   :  { %vm490_vm3 = vmor %vm488_vm0, %vm489_vm15 }
 0x6c0   :  { %v484_v47 = vmul.f32 %v1452_v42, %v483_v43 }
 0x6c2   :  { %v485_v48 = vmul.f32 0.5, %v484_v47 }
 0x6c4   :  { %v486_v49 = vsub.f32 1.5, %v485_v48  ;;  %v1584_v48 = vmov 1.0  }
 0x6c6   :  { %v487_v10 = vmul.f32 %v1452_v42, %v486_v49 }
 0x6c8   :  { %v491_v11 = vsel %vm490_vm3, %v1452_v42, %v487_v10 }
 0x6c9   :  { %v492_v14 = vmul.f32 %v491_v11, %v471_v36 }
 0x6cb   :  { %494 = vrot.lane.b32.xlu0 %v492_v14, %s1581_s0 }
 0x6d3   :  { %509 = vrot.lane.b32.xlu0 %v1671_v27, %s1581_s0 }
 0x73d   :  { %v495_v54 = vpop.permute.xlu0 %494 }
 0x73e   :  { %1325 = vmatmul.msk.f32.vlgmr.msrb.gmra.mxu2 %vm99_vm2, %v495_v54 }
 0x745   :  { %v510_v55 = vpop.permute.xlu0 %509 }
 0x7c1   :  { %v531_v56 = vpop.f32.mrf.mxu2 }
 0x7c2   :  { %v1757_v57 = vadd.f32 %v531_v56, %v510_v55 }
 0x7c4   :  { %v535_v27 = vmul.f32 0.70710677, %v1757_v57  ;;  %v534_v11 = vmul.f32 0.5, %v1757_v57  ;;  %v1374_v57 = vpop.permute.xlu2 %1373 }
 0x7c5   :  { %v1375_v59 = vunpack.i.l.bf16 %v1374_v57 }
 0x7c6   :  { %v538_v60 = vand.u32 2147483647, %v535_v27  ;;  %vm536_vm8 = vcmp.lt.f32.partialorder %v535_v27, 0.0  ;;  %v1376_v27 = vunpack.i.h.bf16 %v1374_v57 }
 0x7c7   :  { %v537_v49 = vsel %vm536_vm8, -1.0, %v1584_v48  ;;  %645 = vmatpush.msra.mxu1 %v1375_v59 }
 0x7c8   :  { %v539_v62 = vmul.f32 0.3275911, %v538_v60  ;;  %v565_v28 = vsub.f32 0.0, %v538_v60 }
 0x7c9   :  { %646 = vmatpush.msra.mxu1 %v1376_v27 }
 0x7ca   :  { %v540_v0 = vadd.f32 1.0, %v539_v62  ;;  %v566_v34 = vmul.f32 %v565_v28, %v538_v60 }
 0x7cc   :  { %1453 = vrcp.f32 %v540_v0  ;;  %v552_v13 = vand.u32 2147483648, %v540_v0  ;;  %v550_v19 = vand.u32 2147483647, %v540_v0  ;;  %vm546_vm5 = vweird.f32 %v540_v0 }
 0x7cd   :  { %v567_v37 = vmul.f32 1.442695, %v566_v34  ;;  %v1787_v34 = vld [vmem:[#allocation5 + $0xe0] sm:$0xff] }
 0x7ce   :  { %v553_v24 = vor.u32 1.1754944e-38, %v552_v13  ;;  %vm551_vm7 = vcmp.eq.f32.partialorder %v550_v19, 8.507059e+37  ;;  %743 = vmatpush.msra.mxu2 %v1787_v34 }
 0x7cf   :  { %1455 = vpow2.f32 %v567_v37  ;;  %v1792_v37 = vld [vmem:[#allocation5 + $0xd0] sm:$0xff] }
 0x7d2   :  { %v1454_v5 = vpop.eup %1453 }
 0x7d3   :  { %v542_v6 = vmul.f32 %v1454_v5, %v540_v0  ;;  %vm547_vm4 = vweird.f32 %v1454_v5 }
 0x7d4   :  { %vm548_vm6 = vmor %vm546_vm5, %vm547_vm4 }
 0x7d5   :  { %v543_v9 = vsub.f32 1.0, %v542_v6  ;;  %v1456_v42 = vpop.eup %1455 }
 0x7d7   :  { %v544_v18 = vmul.f32 %v1454_v5, %v543_v9 }
 0x7d9   :  { %v545_v22 = vadd.f32 %v1454_v5, %v544_v18 }
 0x7db   :  { %v549_v25 = vsel %vm548_vm6, %v1454_v5, %v545_v22 }
 0x7dc   :  { %v554_v26 = vsel %vm551_vm7, %v553_v24, %v549_v25 }
 0x7dd   :  { %v556_v7 = vmul.f32 1.0614054, %v554_v26 }
 0x7df   :  { %v557_v32 = vadd.f32 -1.4531521, %v556_v7 }
 0x7e1   :  { %v558_v35 = vmul.f32 %v557_v32, %v554_v26 }
 0x7e3   :  { %v559_v36 = vadd.f32 1.4214138, %v558_v35  ;;  %v1789_v35 = vld [vmem:[#allocation5 + $0xd8] sm:$0xff] }
 0x7e4   :  { %744 = vmatpush.msra.mxu2 %v1789_v35 }
 0x7e5   :  { %v560_v39 = vmul.f32 %v559_v36, %v554_v26 }
 0x7e6   :  { %745 = vmatpush.msra.mxu2 %v1792_v37 }
 0x7e7   :  { %v561_v40 = vadd.f32 -0.28449672, %v560_v39 }
 0x7e9   :  { %v562_v41 = vmul.f32 %v561_v40, %v554_v26  ;;  %v1795_v40 = vld [vmem:[#allocation5 + $0xc8] sm:$0xff] }
 0x7ea   :  { %746 = vmatpush.msra.mxu2 %v1795_v40 }
 0x7eb   :  { %v563_v45 = vadd.f32 0.2548296, %v562_v41 }
 0x7ed   :  { %v564_v46 = vmul.f32 %v563_v45, %v554_v26 }
 0x7ef   :  { %v569_v43 = vmul.f32 %v1456_v42, %v564_v46  ;;  %v1807_v42 = vld [vmem:[#allocation5 + $0x188] ss:$0 sm:$0xff] }
 0x7f1   :  { %v570_v47 = vsub.f32 1.0, %v569_v43 }
 0x7f3   :  { %v571_v10 = vmul.f32 %v570_v47, %v537_v49 }
 0x7f5   :  { %v572_v14 = vadd.f32 1.0, %v571_v10 }
 0x7f7   :  { %v573_v30 = vmul.f32 %v572_v14, %v534_v11 }
 0x7f9   :  { %v577_v50 = vsel %vm381_vm14, %v573_v30, %v575_v31 }
 0x7fa   :  { %1326 = vmatmul.msk.f32.vlgmr.msrb.gmra.mxu3 %vm579_vm9, %v577_v50 }
 0x87d   :  { %v600_v52 = vpop.f32.mrf.mxu3 }
 0x87e   :  { %v601_v53 = vadd.f32 %v1425_v51, %v600_v52 }
 0x880   :  { %v603_v54 = vmul.f32 0.5, %v601_v53 }
 0x882   :  { %1457 = vtanh.f32 %v603_v54 }
 0x888   :  { %v1458_v55 = vpop.eup %1457 }
 0x889   :  { %v605_v56 = vadd.f32 1.0, %v1458_v55 }
 0x88b   :  { %v606_v58 = vmul.f32 0.5, %v605_v56 }
 0x88d   :  { %608 = vrot.lane.b32.xlu0 %v606_v58, %s1582_s30  ;;  %v659_v3 = vsub.f32 1.0, %v606_v58 }
 0x88f   :  { %v660_v5 = vmul.f32 %v659_v3, %v1733_v29 }
 0x895   :  { %1378 = vrot.lane.b32.xlu0 %v1377_v17, %s1582_s30 }
 0x8ff   :  { %v609_v60 = vpop.permute.xlu0 %608 }
 0x900   :  { %v611_v61 = vmul.f32 %v609_v60, %v1733_v29 }
 0x902   :  { %613 = vrot.lane.b32.xlu0 %v611_v61, %s1581_s0 }
 0x907   :  { %v1379_v62 = vpop.permute.xlu0 %1378 }
 0x908   :  { %v1381_v63 = vunpack.i.h.bf16 %v1379_v62  ;;  %v1380_v0 = vunpack.i.l.bf16 %v1379_v62 }
 0x90a   :  { %647 = vmatpush.msra.mxu1 %v1380_v0 }
 0x90c   :  { %648 = vmatpush.msra.mxu1 %v1381_v63 }
 0x974   :  { %v614_v1 = vpop.permute.xlu0 %613 }
 0x975   :  { %1327 = vmatmul.msk.f32.vlgmr.msra.gmra.mxu1 %vm99_vm2, %v614_v1 }
 0x9f2   :  { %v650_v15 = vpop.f32.mrf.mxu1 }
 0x9f3   :  { %654 = vrot.lane.b32.xlu1 %v650_v15, %s1583_s4 }
 0xa65   :  { %v655_v16 = vpop.permute.xlu1 %654 }
 0xa66   :  { %v657_v17 = vadd.f32 %v655_v16, %v601_v53 }
 0xa68   :  { %1459 = vtanh.f32 %v657_v17 }
 0xa6e   :  { %v1460_v2 = vpop.eup %1459 }
 0xa6f   :  { %662 = vrot.lane.b32.xlu0 %v1460_v2, %s1581_s0 }
 0xae1   :  { %v663_v4 = vpop.permute.xlu0 %662 }
 0xae2   :  { %v665_v6 = vmul.f32 %v663_v4, %v606_v58 }
 0xae4   :  { %v1775_v8 = vadd.f32 %v665_v6, %v660_v5  ;;  %v678_v6 = vld [vmem:[#allocation5 + $0x118] sm:$0xff] }
 0xae6   :  { %696 = vrot.lane.b32.xlu2 %v1775_v8, %s1581_s0 }
 0xb40   :  { %v697_v9 = vpop.permute.xlu2 %696 }
 0xb41   :  { %v699_v12 = vsel %vm217_vm1, %v697_v9, 0.0 }
 0xb42   :  { %700 = vadd.xlane.f32.xlu1 %v699_v12  ;;  %v677_v12 = vld [vmem:[#allocation5 + $0x110] sm:$0xff] }
 0xb5b   :  { %836 = vrot.lane.b32.xlu1 %v1680_v38, %s1582_s30 }
 0xbb5   :  { %v701_v13 = vpop.xlane.xlu1 %700 }
 0xbb6   :  { %v702_v18 = vmul.f32 %v701_v13, %v1630_v23  ;;  %v676_v13 = vld [vmem:[#allocation5 + $0x108] sm:$0xff] }
 0xbb8   :  { %v703_v19 = vsub.f32 %v1775_v8, %v702_v18  ;;  %v1817_v18 = vld [vmem:[#allocation5 + $0x100] sm:$0xff] }
 0xbba   :  { %v704_v20 = vmul.f32 %v703_v19, %v703_v19 }
 0xbbc   :  { %706 = vrot.lane.b32.xlu0 %v704_v20, %s1581_s0  ;;  %v1821_v20 = vld [vmem:[#allocation5 + $0xf0] sm:$0xff] }
 0xc2e   :  { %v707_v29 = vpop.permute.xlu0 %706 }
 0xc2f   :  { %v709_v21 = vsel %vm217_vm1, %v707_v29, 0.0  ;;  %v1823_v29 = vld [vmem:[#allocation5 + $0xe8] sm:$0xff] }
 0xc30   :  { %710 = vadd.xlane.f32.xlu2 %v709_v21 }
 0xca3   :  { %v711_v22 = vpop.xlane.xlu2 %710 }
 0xca4   :  { %v712_v24 = vmul.f32 %v711_v22, %v1630_v23 }
 0xca6   :  { %v713_v25 = vadd.f32 1e-05, %v712_v24  ;;  %v1407_v24 = vpack.i.bf16 %v1823_v29, %v1821_v20 }
 0xca8   :  { %1461 = vrsqrt.f32 %v713_v25  ;;  %vm720_vm11 = vweird.f32 %v713_v25 }
 0xcae   :  { %v1462_v26 = vpop.eup %1461 }
 0xcaf   :  { %v715_v28 = vmul.f32 %v1462_v26, %v713_v25  ;;  %vm721_vm10 = vweird.f32 %v1462_v26 }
 0xcb0   :  { %vm722_vm12 = vmor %vm720_vm11, %vm721_vm10 }
 0xcb1   :  { %v716_v7 = vmul.f32 %v1462_v26, %v715_v28 }
 0xcb3   :  { %v717_v32 = vmul.f32 0.5, %v716_v7 }
 0xcb5   :  { %v718_v36 = vsub.f32 1.5, %v717_v32 }
 0xcb7   :  { %v719_v39 = vmul.f32 %v1462_v26, %v718_v36 }
 0xcb9   :  { %v723_v41 = vsel %vm722_vm12, %v1462_v26, %v719_v39 }
 0xcba   :  { %v724_v45 = vmul.f32 %v723_v41, %v703_v19  ;;  %v1819_v19 = vld [vmem:[#allocation5 + $0xf8] sm:$0xff] }
 0xcbb   :  { %v1402_v22 = vpack.i.bf16 %v1819_v19, %v1817_v18 }
 0xcbc   :  { %727 = vrot.lane.b32.xlu0 %v724_v45, %s1581_s0 }
 0xcc4   :  { %757 = vrot.lane.b32.xlu0 %v1674_v33, %s1583_s4 }
 0xccc   :  { %759 = vrot.lane.b32.xlu0 %v1680_v38, %s1583_s4 }
 0xcd4   :  { %834 = vrot.lane.b32.xlu0 %v1674_v33, %s1582_s30 }
 0xd2e   :  { %v728_v46 = vpop.permute.xlu0 %727 }
 0xd2f   :  { %1328 = vmatmul.msk.f32.vlgmr.msra.gmra.mxu2 %vm99_vm2, %v728_v46 }
 0xd36   :  { %v758_v49 = vpop.permute.xlu0 %757 }
 0xd3e   :  { %v760_v31 = vpop.permute.xlu0 %759 }
 0xdb2   :  { %v748_v43 = vpop.f32.mrf.mxu2 }
 0xdb3   :  { %v749_v47 = vadd.f32 %v1807_v42, %v748_v43 }
 0xdb5   :  { %v753_v10 = vperm.slane %v749_v47, 0  ;;  %v752_v11 = vrot.slane %v749_v47, 1 }
 0xdb7   :  { %v763_v14 = vmul.f32 %v758_v49, %v753_v10  ;;  %v754_v30 = vperm.slane %v752_v11, 0  ;;  %v835_v10 = vpop.permute.xlu0 %834 }
 0xdb9   :  { %1329 = vmatmul.msk.f32.vlgmr.msrb.gmra.mxu0 %vm99_vm2, %v763_v14  ;;  %v764_v38 = vmul.f32 %v760_v31, %v754_v30 }
 0xdc1   :  { %1330 = vmatmul.msk.f32.gmra.mxu0 %vm99_vm2, %v764_v38 }
 0xe36   :  { %v788_v33 = vpop.f32.mrf.mxu0 }
 0xe37   :  { %v794_v50 = vadd.f32 %v788_v33, %v1688_v44 }
 0xe39   :  { %v796_v51 = vsel %vm99_vm2, %v794_v50, -inf }
 0xe3a   :  { %v797_v52 = vrot.slane %v796_v51, 4 }
 0xe3c   :  { %v798_v53 = vmax.f32 %v796_v51, %v797_v52 }
 0xe3e   :  { %v799_v54 = vrot.slane %v798_v53, 2  ;;  %v791_v55 = vpop.f32.mrf.mxu0 }
 0xe3f   :  { %v795_v56 = vadd.f32 %v791_v55, %v1688_v44  ;;  %v679_v44 = vld [vmem:[#allocation5 + $0x120] sm:$0xff] }
 0xe40   :  { %v800_v58 = vmax.f32 %v798_v53, %v799_v54  ;;  %873 = vmatpush.msrb.mxu1 %v679_v44  ;;  %v1382_v44 = vpack.i.bf16 %v1789_v35, %v1787_v34 }
 0xe41   :  { %v803_v57 = vsel %vm99_vm2, %v795_v56, -inf }
 0xe42   :  { %v801_v27 = vrot.slane %v800_v58, 1  ;;  %v804_v59 = vrot.slane %v803_v57, 4  ;;  %874 = vmatpush.msrb.mxu1 %v678_v6  ;;  %1383 = vrot.lane.b32.xlu2 %v1382_v44, %s1582_s30 }
 0xe44   :  { %v802_v60 = vmax.f32 %v800_v58, %v801_v27  ;;  %v805_v61 = vmax.f32 %v803_v57, %v804_v59  ;;  %875 = vmatpush.msrb.mxu1 %v677_v12 }
 0xe46   :  { %v810_v62 = vsub.f32 %v794_v50, %v802_v60  ;;  %v806_v63 = vrot.slane %v805_v61, 2  ;;  %876 = vmatpush.msrb.mxu1 %v676_v13  ;;  %v837_v50 = vpop.permute.xlu1 %836 }
 0xe48   :  { %v812_v0 = vmul.f32 1.442695, %v810_v62  ;;  %v807_v1 = vmax.f32 %v805_v61, %v806_v63  ;;  %877 = vmatpush.msrb.mxu1 %v1817_v18 }
 0xe4a   :  { %1463 = vpow2.f32 %v812_v0  ;;  %v808_v15 = vrot.slane %v807_v1, 1  ;;  %878 = vmatpush.msrb.mxu1 %v1819_v19  ;;  %v1427_v0 = vld [vmem:[#allocation5 + $0x189] ss:$0 sm:$0xff] }
 0xe4c   :  { %v809_v16 = vmax.f32 %v807_v1, %v808_v15  ;;  %879 = vmatpush.msrb.mxu1 %v1821_v20 }
 0xe4e   :  { %v811_v17 = vsub.f32 %v795_v56, %v809_v16  ;;  %880 = vmatpush.msrb.mxu1 %v1823_v29  ;;  %v690_v29 = vld [vmem:[#allocation5 + $0x178] sm:$0xff] }
 0xe50   :  { %v1464_v2 = vpop.eup %1463  ;;  %v814_v3 = vmul.f32 1.442695, %v811_v17 }
 0xe51   :  { %v816_v4 = vsel %vm99_vm2, %v1464_v2, 0.0 }
 0xe52   :  { %v817_v5 = vrot.slane %v816_v4, 4  ;;  %1465 = vpow2.f32 %v814_v3 }
 0xe54   :  { %v818_v9 = vadd.f32 %v817_v5, %v816_v4  ;;  %v1387_v4 = vpack.i.bf16 %v1795_v40, %v1792_v37 }
 0xe56   :  { %v819_v21 = vrot.slane %v818_v9, 2 }
 0xe58   :  { %v1466_v25 = vpop.eup %1465  ;;  %v820_v26 = vadd.f32 %v819_v21, %v818_v9 }
 0xe59   :  { %v823_v28 = vsel %vm99_vm2, %v1466_v25, 0.0 }
 0xe5a   :  { %v821_v7 = vrot.slane %v820_v26, 1  ;;  %v824_v32 = vrot.slane %v823_v28, 4 }
 0xe5c   :  { %v822_v36 = vadd.f32 %v821_v7, %v820_v26  ;;  %v825_v39 = vadd.f32 %v824_v32, %v823_v28 }
 0xe5e   :  { %1467 = vrcp.f32 %v822_v36  ;;  %v826_v41 = vrot.slane %v825_v39, 2 }
 0xe60   :  { %v827_v45 = vadd.f32 %v826_v41, %v825_v39 }
 0xe62   :  { %v828_v46 = vrot.slane %v827_v45, 1 }
 0xe64   :  { %v1468_v43 = vpop.eup %1467  ;;  %v829_v47 = vadd.f32 %v828_v46, %v827_v45 }
 0xe65   :  { %v832_v49 = vmul.f32 %v1468_v43, %v1464_v2 }
 0xe66   :  { %1469 = vrcp.f32 %v829_v47 }
 0xe67   :  { %v840_v11 = vmul.f32 %v835_v10, %v832_v49 }
 0xe69   :  { %v842_v14 = vsel %vm99_vm2, %v840_v11, 0.0 }
 0xe6a   :  { %v843_v30 = vrot.slane %v842_v14, 4 }
 0xe6c   :  { %v1470_v31 = vpop.eup %1469  ;;  %v844_v38 = vadd.f32 %v843_v30, %v842_v14 }
 0xe6d   :  { %v833_v33 = vmul.f32 %v1470_v31, %v1466_v25 }
 0xe6e   :  { %v845_v52 = vrot.slane %v844_v38, 2 }
 0xe6f   :  { %v841_v51 = vmul.f32 %v837_v50, %v833_v33 }
 0xe70   :  { %v846_v56 = vadd.f32 %v845_v52, %v844_v38 }
 0xe71   :  { %v849_v53 = vsel %vm99_vm2, %v841_v51, 0.0 }
 0xe72   :  { %v850_v54 = vrot.slane %v849_v53, 4  ;;  %v847_v57 = vrot.slane %v846_v56, 1 }
 0xe74   :  { %v851_v55 = vadd.f32 %v850_v54, %v849_v53  ;;  %v848_v60 = vadd.f32 %v847_v57, %v846_v56 }
 0xe76   :  { %v852_v58 = vrot.slane %v851_v55, 2 }
 0xe78   :  { %v853_v27 = vadd.f32 %v852_v58, %v851_v55 }
 0xe7a   :  { %v854_v59 = vrot.slane %v853_v27, 1 }
 0xe7c   :  { %v855_v61 = vadd.f32 %v854_v59, %v853_v27 }
 0xe7e   :  { %v858_v62 = vsel %vm372_vm13, %v855_v61, %v848_v60  ;;  %v691_v61 = vld [vmem:[#allocation5 + $0x180] sm:$0xff] }
 0xe7f   :  { %v860_v63 = vsel %vm99_vm2, %v858_v62, %v1775_v8  ;;  %1072 = vmatpush.msra.mxu0 %v691_v61  ;;  %v689_v62 = vld [vmem:[#allocation5 + $0x170] sm:$0xff] }
 0xe80   :  { %1331 = vmatmul.msk.f32.vlgmr.msrb.gmra.mxu1 %vm381_vm14, %v860_v63 }
 0xe81   :  { %1073 = vmatpush.msra.mxu0 %v690_v29 }
 0xe83   :  { %1074 = vmatpush.msra.mxu0 %v689_v62 }
 0xe9c   :  { %v1384_v9 = vpop.permute.xlu2 %1383 }
 0xe9d   :  { %v1386_v13 = vunpack.i.h.bf16 %v1384_v9  ;;  %v1385_v21 = vunpack.i.l.bf16 %v1384_v9 }
 0xe9f   :  { %927 = vmatpush.msrb.mxu2 %v1385_v21  ;;  %v681_v21 = vld [vmem:[#allocation5 + $0x130] sm:$0xff] }
 0xea1   :  { %928 = vmatpush.msrb.mxu2 %v1386_v13 }
 0xefd   :  { %v882_v1 = vpop.f32.mrf.mxu1 }
 0xefe   :  { %v883_v15 = vadd.f32 %v1427_v0, %v882_v1  ;;  %v688_v0 = vld [vmem:[#allocation5 + $0x168] sm:$0xff] }
 0xeff   :  { %1075 = vmatpush.msra.mxu0 %v688_v0 }
 0xf00   :  { %v885_v16 = vmul.f32 0.5, %v883_v15 }
 0xf02   :  { %1471 = vtanh.f32 %v885_v16  ;;  %v686_v16 = vld [vmem:[#allocation5 + $0x158] sm:$0xff] }
 0xf08   :  { %v1472_v17 = vpop.eup %1471 }
 0xf09   :  { %v887_v2 = vadd.f32 1.0, %v1472_v17  ;;  %v685_v17 = vld [vmem:[#allocation5 + $0x150] sm:$0xff] }
 0xf0b   :  { %v888_v3 = vmul.f32 0.5, %v887_v2  ;;  %v684_v2 = vld [vmem:[#allocation5 + $0x148] sm:$0xff] }
 0xf0d   :  { %890 = vrot.lane.b32.xlu0 %v888_v3, %s1582_s30  ;;  %v941_v7 = vsub.f32 1.0, %v888_v3 }
 0xf0f   :  { %v942_v36 = vmul.f32 %v941_v7, %v1775_v8 }
 0xf15   :  { %1388 = vrot.lane.b32.xlu0 %v1387_v4, %s1582_s30 }
 0xf7f   :  { %v891_v5 = vpop.permute.xlu0 %890 }
 0xf80   :  { %v893_v6 = vmul.f32 %v891_v5, %v1775_v8 }
 0xf82   :  { %895 = vrot.lane.b32.xlu0 %v893_v6, %s1581_s0  ;;  %v682_v6 = vld [vmem:[#allocation5 + $0x138] sm:$0xff] }
 0xf87   :  { %v1389_v12 = vpop.permute.xlu0 %1388 }
 0xf88   :  { %v1390_v25 = vunpack.i.l.bf16 %v1389_v12  ;;  %v1391_v26 = vunpack.i.h.bf16 %v1389_v12 }
 0xf8a   :  { %929 = vmatpush.msrb.mxu2 %v1390_v25  ;;  %v680_v25 = vld [vmem:[#allocation5 + $0x128] sm:$0xff] }
 0xf8c   :  { %930 = vmatpush.msrb.mxu2 %v1391_v26 }
 0xff4   :  { %v896_v37 = vpop.permute.xlu0 %895 }
 0xff5   :  { %1332 = vmatmul.msk.f32.vlgmr.msrb.gmra.mxu2 %vm99_vm2, %v896_v37 }
0x1078   :  { %v932_v34 = vpop.f32.mrf.mxu2 }
0x1079   :  { %936 = vrot.lane.b32.xlu1 %v932_v34, %s1583_s4 }
0x10eb   :  { %v937_v35 = vpop.permute.xlu1 %936 }
0x10ec   :  { %v939_v40 = vadd.f32 %v937_v35, %v883_v15  ;;  %v687_v15 = vld [vmem:[#allocation5 + $0x160] sm:$0xff] }
0x10ed   :  { %1076 = vmatpush.msra.mxu0 %v687_v15 }
0x10ee   :  { %1473 = vtanh.f32 %v939_v40 }
0x10ef   :  { %1077 = vmatpush.msra.mxu0 %v686_v16 }
0x10f1   :  { %1078 = vmatpush.msra.mxu0 %v685_v17 }
0x10f3   :  { %1079 = vmatpush.msra.mxu0 %v684_v2 }
0x10f4   :  { %v1474_v28 = vpop.eup %1473 }
0x10f5   :  { %944 = vrot.lane.b32.xlu0 %v1474_v28, %s1581_s0 }
0x1167   :  { %v945_v32 = vpop.permute.xlu0 %944 }
0x1168   :  { %v947_v39 = vmul.f32 %v945_v32, %v888_v3 }
0x116a   :  { %v1853_v41 = vadd.f32 %v947_v39, %v942_v36 }
0x116c   :  { %950 = vrot.lane.b32.xlu2 %v1853_v41, %s1581_s0 }
0x11c6   :  { %v951_v45 = vpop.permute.xlu2 %950 }
0x11c7   :  { %v953_v46 = vsel %vm217_vm1, %v951_v45, 0.0 }
0x11c8   :  { %954 = vadd.xlane.f32.xlu1 %v953_v46 }
0x123b   :  { %v955_v43 = vpop.xlane.xlu1 %954 }
0x123c   :  { %v956_v47 = vmul.f32 %v955_v43, %v1630_v23 }
0x123e   :  { %v957_v49 = vsub.f32 %v1853_v41, %v956_v47 }
0x1240   :  { %v958_v10 = vmul.f32 %v957_v49, %v957_v49 }
0x1242   :  { %960 = vrot.lane.b32.xlu0 %v958_v10, %s1581_s0 }
0x124a   :  { %1393 = vrot.lane.b32.xlu0 %v1382_v44, %s1581_s0  ;;  %v683_v44 = vld [vmem:[#allocation5 + $0x140] sm:$0xff] }
0x124b   :  { %1080 = vmatpush.msra.mxu0 %v683_v44 }
0x124d   :  { %1081 = vmatpush.msra.mxu0 %v682_v6 }
0x124f   :  { %1082 = vmatpush.msra.mxu0 %v681_v21  ;;  %v1494_v21 = vld [vmem:[#allocation2 + $0x68] sm:$0xff] }
0x1251   :  { %1083 = vmatpush.msra.mxu0 %v680_v25 }
0x1252   :  { %1398 = vrot.lane.b32.xlu0 %v1387_v4, %s1581_s0 }
0x12b4   :  { %v961_v11 = vpop.permute.xlu0 %960 }
0x12b5   :  { %v963_v8 = vsel %vm217_vm1, %v961_v11, 0.0 }
0x12b6   :  { %964 = vadd.xlane.f32.xlu2 %v963_v8 }
0x12ce   :  { %1403 = vrot.lane.b32.xlu2 %v1402_v22, %s1582_s30  ;;  %v1394_v22 = vpop.permute.xlu0 %1393 }
0x12cf   :  { %v1396_v54 = vunpack.i.h.bf16 %v1394_v22  ;;  %v1395_v55 = vunpack.i.l.bf16 %v1394_v22 }
0x12d1   :  { %1012 = vmatpush.msra.mxu3 %v1395_v55 }
0x12d3   :  { %1013 = vmatpush.msra.mxu3 %v1396_v54 }
0x12d6   :  { %v1399_v56 = vpop.permute.xlu0 %1398 }
0x12d7   :  { %v1401_v58 = vunpack.i.h.bf16 %v1399_v56  ;;  %v1400_v57 = vunpack.i.l.bf16 %v1399_v56 }
0x12d9   :  { %1014 = vmatpush.msra.mxu3 %v1400_v57 }
0x12db   :  { %1015 = vmatpush.msra.mxu3 %v1401_v58 }
0x1329   :  { %v965_v14 = vpop.xlane.xlu2 %964 }
0x132a   :  { %v966_v30 = vmul.f32 %v965_v14, %v1630_v23 }
0x132c   :  { %v967_v31 = vadd.f32 1e-05, %v966_v30 }
0x132e   :  { %1475 = vrsqrt.f32 %v967_v31  ;;  %vm974_vm15 = vweird.f32 %v967_v31 }
0x1331   :  { %v1404_v58 = vpop.permute.xlu2 %1403 }
0x1334   :  { %v1476_v38 = vpop.eup %1475 }
0x1335   :  { %v969_v33 = vmul.f32 %v1476_v38, %v967_v31  ;;  %vm975_vm13 = vweird.f32 %v1476_v38 }
0x1336   :  { %vm976_vm0 = vmor %vm974_vm15, %vm975_vm13 }
0x1337   :  { %v970_v50 = vmul.f32 %v1476_v38, %v969_v33 }
0x1339   :  { %v971_v51 = vmul.f32 0.5, %v970_v50 }
0x133b   :  { %v972_v52 = vsub.f32 1.5, %v971_v51 }
0x133d   :  { %v973_v53 = vmul.f32 %v1476_v38, %v972_v52 }
0x133f   :  { %v977_v18 = vsel %vm976_vm0, %v1476_v38, %v973_v53  ;;  %v1428_v53 = vld [vmem:[#allocation5 + $0x18a] ss:$0 sm:$0xff] }
0x1340   :  { %v978_v19 = vmul.f32 %v977_v18, %v957_v49 }
0x1342   :  { %980 = vrot.lane.b32.xlu0 %v978_v19, %s1581_s0 }
0x134a   :  { %995 = vrot.lane.b32.xlu0 %v1807_v42, %s1581_s0 }
0x1352   :  { %1060 = vrot.lane.b32.xlu0 %v1853_v41, %s1582_s30 }
0x135a   :  { %1408 = vrot.lane.b32.xlu0 %v1407_v24, %s1582_s30 }
0x13b4   :  { %v981_v27 = vpop.permute.xlu0 %980 }
0x13b5   :  { %1333 = vmatmul.msk.f32.vlgmr.msra.gmra.mxu3 %vm99_vm2, %v981_v27  ;;  %v1406_v27 = vunpack.i.h.bf16 %v1404_v58 }
0x13bc   :  { %v996_v42 = vpop.permute.xlu0 %995 }
0x13c4   :  { %v1061_v51 = vpop.permute.xlu0 %1060 }
0x13cc   :  { %v1409_v57 = vpop.permute.xlu0 %1408 }
0x1438   :  { %v1017_v59 = vpop.f32.mrf.mxu3 }
0x1439   :  { %v1879_v60 = vadd.f32 %v1017_v59, %v996_v42  ;;  %v1405_v42 = vunpack.i.l.bf16 %v1404_v58  ;;  %v1410_v59 = vunpack.i.l.bf16 %v1409_v57  ;;  %v1266_v58 = vld [vmem:[#allocation2 + $0x80] sm:$0xff] }
0x143b   :  { %v1021_v20 = vmul.f32 0.70710677, %v1879_v60  ;;  %v1020_v38 = vmul.f32 0.5, %v1879_v60  ;;  %1130 = vmatpush.msra.mxu2 %v1405_v42  ;;  %v1411_v60 = vunpack.i.h.bf16 %v1409_v57  ;;  %v1265_v42 = vld [vmem:[#allocation2 + $0x78] sm:$0xff] }
0x143d   :  { %v1024_v24 = vand.u32 2147483647, %v1021_v20  ;;  %vm1022_vm7 = vcmp.lt.f32.partialorder %v1021_v20, 0.0  ;;  %1131 = vmatpush.msra.mxu2 %v1406_v27 }
0x143e   :  { %v1023_v30 = vsel %vm1022_vm7, -1.0, %v1584_v48 }
0x143f   :  { %v1025_v63 = vmul.f32 0.3275911, %v1024_v24  ;;  %v1051_v40 = vsub.f32 0.0, %v1024_v24  ;;  %1132 = vmatpush.msra.mxu2 %v1410_v59 }
0x1441   :  { %v1026_v1 = vadd.f32 1.0, %v1025_v63  ;;  %v1052_v32 = vmul.f32 %v1051_v40, %v1024_v24  ;;  %1133 = vmatpush.msra.mxu2 %v1411_v60 }
0x1443   :  { %1477 = vrcp.f32 %v1026_v1  ;;  %v1038_v9 = vand.u32 2147483648, %v1026_v1  ;;  %v1036_v13 = vand.u32 2147483647, %v1026_v1  ;;  %vm1032_vm4 = vweird.f32 %v1026_v1 }
0x1444   :  { %v1053_v45 = vmul.f32 1.442695, %v1052_v32 }
0x1445   :  { %v1039_v37 = vor.u32 1.1754944e-38, %v1038_v9  ;;  %vm1037_vm6 = vcmp.eq.f32.partialorder %v1036_v13, 8.507059e+37 }
0x1446   :  { %1479 = vpow2.f32 %v1053_v45 }
0x1449   :  { %v1478_v3 = vpop.eup %1477 }
0x144a   :  { %v1028_v4 = vmul.f32 %v1478_v3, %v1026_v1  ;;  %vm1033_vm3 = vweird.f32 %v1478_v3 }
0x144b   :  { %vm1034_vm5 = vmor %vm1032_vm4, %vm1033_vm3 }
0x144c   :  { %v1029_v5 = vsub.f32 1.0, %v1028_v4  ;;  %v1480_v11 = vpop.eup %1479 }
0x144e   :  { %v1030_v12 = vmul.f32 %v1478_v3, %v1029_v5 }
0x1450   :  { %v1031_v26 = vadd.f32 %v1478_v3, %v1030_v12 }
0x1452   :  { %v1035_v34 = vsel %vm1034_vm5, %v1478_v3, %v1031_v26  ;;  %v1495_v26 = vld [vmem:[#allocation2 + $0x60] sm:$0xff] }
0x1453   :  { %v1040_v35 = vsel %vm1037_vm6, %v1039_v37, %v1035_v34  ;;  %v1496_v37 = vld [vmem:[#allocation2 + $0x58] sm:$0xff] }
0x1454   :  { %v1042_v28 = vmul.f32 1.0614054, %v1040_v35  ;;  %v1417_v34 = vpack.i.bf16 %v1496_v37, %v1495_v26 }
0x1456   :  { %v1043_v7 = vadd.f32 -1.4531521, %v1042_v28 }
0x1458   :  { %v1044_v36 = vmul.f32 %v1043_v7, %v1040_v35 }
0x145a   :  { %v1045_v39 = vadd.f32 1.4214138, %v1044_v36 }
0x145c   :  { %v1046_v46 = vmul.f32 %v1045_v39, %v1040_v35 }
0x145e   :  { %v1047_v43 = vadd.f32 -0.28449672, %v1046_v46 }
0x1460   :  { %v1048_v47 = vmul.f32 %v1047_v43, %v1040_v35 }
0x1462   :  { %v1049_v49 = vadd.f32 0.2548296, %v1048_v47 }
0x1464   :  { %v1050_v10 = vmul.f32 %v1049_v49, %v1040_v35 }
0x1466   :  { %v1055_v8 = vmul.f32 %v1480_v11, %v1050_v10 }
0x1468   :  { %v1056_v14 = vsub.f32 1.0, %v1055_v8 }
0x146a   :  { %v1057_v31 = vmul.f32 %v1056_v14, %v1023_v30 }
0x146c   :  { %v1058_v33 = vadd.f32 1.0, %v1057_v31  ;;  %v1429_v31 = vld [vmem:[#allocation2 + $0x51] ss:$0 sm:$0xff] }
0x146e   :  { %v1059_v50 = vmul.f32 %v1058_v33, %v1020_v38 }
0x1470   :  { %v1063_v52 = vsel %vm381_vm14, %v1059_v50, %v1061_v51 }
0x1471   :  { %1334 = vmatmul.msk.f32.vlgmr.msra.gmra.mxu0 %vm579_vm9, %v1063_v52 }
0x14ee   :  { %v1085_v18 = vpop.f32.mrf.mxu0 }
0x14ef   :  { %v1086_v19 = vadd.f32 %v1428_v53, %v1085_v18 }
0x14f1   :  { %v1088_v22 = vmul.f32 0.5, %v1086_v19 }
0x14f3   :  { %1481 = vtanh.f32 %v1088_v22 }
0x14f9   :  { %v1482_v54 = vpop.eup %1481 }
0x14fa   :  { %v1090_v55 = vadd.f32 1.0, %v1482_v54  ;;  %v1267_v54 = vld [vmem:[#allocation2 + $0x88] sm:$0xff] }
0x14fc   :  { %v1091_v56 = vmul.f32 0.5, %v1090_v55 }
0x14fe   :  { %1093 = vrot.lane.b32.xlu1 %v1091_v56, %s1582_s30  ;;  %v1144_v1 = vsub.f32 1.0, %v1091_v56 }
0x1500   :  { %v1145_v16 = vmul.f32 %v1144_v1, %v1853_v41 }
0x1570   :  { %v1094_v61 = vpop.permute.xlu1 %1093 }
0x1571   :  { %v1096_v20 = vmul.f32 %v1094_v61, %v1853_v41  ;;  %v1493_v41 = vld [vmem:[#allocation2 + $0x70] sm:$0xff] }
0x1572   :  { %v1412_v25 = vpack.i.bf16 %v1494_v21, %v1493_v41 }
0x1573   :  { %1098 = vrot.lane.b32.xlu0 %v1096_v20, %s1581_s0 }
0x15e5   :  { %v1099_v29 = vpop.permute.xlu0 %1098 }
0x15e6   :  { %1335 = vmatmul.msk.f32.vlgmr.msra.gmra.mxu2 %vm99_vm2, %v1099_v29 }
0x1669   :  { %v1135_v24 = vpop.f32.mrf.mxu2 }
0x166a   :  { %1139 = vrot.lane.b32.xlu0 %v1135_v24, %s1583_s4 }
0x16dc   :  { %v1140_v62 = vpop.permute.xlu0 %1139 }
0x16dd   :  { %v1142_v63 = vadd.f32 %v1140_v62, %v1086_v19  ;;  %v1268_v19 = vld [vmem:[#allocation2 + $0x90] sm:$0xff] }
0x16de   :  { %1286 = vmatpush.msra.mxu1 %v1268_v19 }
0x16df   :  { %1483 = vtanh.f32 %v1142_v63 }
0x16e0   :  { %1287 = vmatpush.msra.mxu1 %v1267_v54 }
0x16e2   :  { %1288 = vmatpush.msra.mxu1 %v1266_v58 }
0x16e4   :  { %1289 = vmatpush.msra.mxu1 %v1265_v42 }
0x16e5   :  { %v1484_v0 = vpop.eup %1483 }
0x16e6   :  { %1147 = vrot.lane.b32.xlu1 %v1484_v0, %s1581_s0 }
0x1758   :  { %v1148_v15 = vpop.permute.xlu1 %1147 }
0x1759   :  { %v1150_v17 = vmul.f32 %v1148_v15, %v1091_v56 }
0x175b   :  { %v1151_v2 = vadd.f32 %v1150_v17, %v1145_v16 }
0x175d   :  { %1153 = vrot.lane.b32.xlu2 %v1151_v2, %s1581_s0 }
0x17b7   :  { %v1154_v3 = vpop.permute.xlu2 %1153 }
0x17b8   :  { %v1156_v4 = vsel %vm217_vm1, %v1154_v3, 0.0 }
0x17b9   :  { %1157 = vadd.xlane.f32.xlu0 %v1156_v4 }
0x182c   :  { %v1158_v44 = vpop.xlane.xlu0 %1157 }
0x182d   :  { %v1159_v5 = vmul.f32 %v1158_v44, %v1630_v23 }
0x182f   :  { %v1160_v6 = vsub.f32 %v1151_v2, %v1159_v5 }
0x1831   :  { %v1161_v9 = vmul.f32 %v1160_v6, %v1160_v6 }
0x1833   :  { %1163 = vrot.lane.b32.xlu1 %v1161_v9, %s1581_s0 }
0x183b   :  { %1413 = vrot.lane.b32.xlu1 %v1412_v25, %s1581_s0  ;;  %v1430_v25 = vld [vmem:[#allocation2 + $0x52] ss:$0 sm:$0xff] }
0x1843   :  { %1418 = vrot.lane.b32.xlu1 %v1417_v34, %s1581_s0 }
0x18a5   :  { %v1164_v12 = vpop.permute.xlu1 %1163 }
0x18a6   :  { %v1166_v13 = vsel %vm217_vm1, %v1164_v12, 0.0 }
0x18a7   :  { %1167 = vadd.xlane.f32.xlu2 %v1166_v13 }
0x18ad   :  { %v1414_v49 = vpop.permute.xlu1 %1413 }
0x18ae   :  { %v1416_v10 = vunpack.i.h.bf16 %v1414_v49  ;;  %v1415_v11 = vunpack.i.l.bf16 %v1414_v49 }
0x18b0   :  { %1217 = vmatpush.msrb.mxu3 %v1415_v11 }
0x18b2   :  { %1218 = vmatpush.msrb.mxu3 %v1416_v10 }
0x191a   :  { %v1168_v35 = vpop.xlane.xlu2 %1167 }
0x191b   :  { %v1169_v40 = vmul.f32 %v1168_v35, %v1630_v23  ;;  %v1419_v23 = vpop.permute.xlu1 %1418 }
0x191c   :  { %v1421_v8 = vunpack.i.h.bf16 %v1419_v23  ;;  %v1420_v14 = vunpack.i.l.bf16 %v1419_v23 }
0x191d   :  { %v1170_v28 = vadd.f32 1e-05, %v1169_v40 }
0x191e   :  { %1219 = vmatpush.msrb.mxu3 %v1420_v14 }
0x191f   :  { %1485 = vrsqrt.f32 %v1170_v28  ;;  %vm1177_vm14 = vweird.f32 %v1170_v28 }
0x1920   :  { %1220 = vmatpush.msrb.mxu3 %v1421_v8 }
0x1925   :  { %v1486_v7 = vpop.eup %1485 }
0x1926   :  { %v1172_v32 = vmul.f32 %v1486_v7, %v1170_v28  ;;  %vm1178_vm1 = vweird.f32 %v1486_v7 }
0x1927   :  { %vm1179_vm8 = vmor %vm1177_vm14, %vm1178_vm1 }
0x1928   :  { %v1173_v36 = vmul.f32 %v1486_v7, %v1172_v32 }
0x192a   :  { %v1174_v39 = vmul.f32 0.5, %v1173_v36 }
0x192c   :  { %v1175_v45 = vsub.f32 1.5, %v1174_v39 }
0x192e   :  { %v1176_v46 = vmul.f32 %v1486_v7, %v1175_v45 }
0x1930   :  { %v1180_v43 = vsel %vm1179_vm8, %v1486_v7, %v1176_v46 }
0x1931   :  { %v1181_v47 = vmul.f32 %v1180_v43, %v1160_v6 }
0x1933   :  { %1185 = vrot.lane.b32.xlu1 %v1181_v47, %s1581_s0 }
0x19a5   :  { %v1186_v30 = vpop.permute.xlu1 %1185 }
0x19a6   :  { %1336 = vmatmul.msk.f32.vlgmr.msrb.gmra.mxu3 %vm99_vm2, %v1186_v30 }
0x1a29   :  { %v1222_v38 = vpop.f32.mrf.mxu3 }
0x1a2a   :  { %v1223_v33 = vadd.f32 %v1429_v31, %v1222_v38 }
0x1a2c   :  { %v1226_v50 = vmul.f32 0.70710677, %v1223_v33  ;;  %v1225_v13 = vmul.f32 0.5, %v1223_v33 }
0x1a2e   :  { %v1229_v51 = vand.u32 2147483647, %v1226_v50  ;;  %vm1227_vm13 = vcmp.lt.f32.partialorder %v1226_v50, 0.0 }
0x1a2f   :  { %v1228_v9 = vsel %vm1227_vm13, -1.0, %v1584_v48 }
0x1a30   :  { %v1230_v52 = vmul.f32 0.3275911, %v1229_v51  ;;  %v1256_v29 = vsub.f32 0.0, %v1229_v51 }
0x1a32   :  { %v1231_v53 = vadd.f32 1.0, %v1230_v52  ;;  %v1257_v63 = vmul.f32 %v1256_v29, %v1229_v51 }
0x1a34   :  { %1487 = vrcp.f32 %v1231_v53  ;;  %v1243_v56 = vand.u32 2147483648, %v1231_v53  ;;  %v1241_v27 = vand.u32 2147483647, %v1231_v53  ;;  %vm1237_vm10 = vweird.f32 %v1231_v53 }
0x1a35   :  { %v1258_v15 = vmul.f32 1.442695, %v1257_v63 }
0x1a36   :  { %v1244_v60 = vor.u32 1.1754944e-38, %v1243_v56  ;;  %vm1242_vm12 = vcmp.eq.f32.partialorder %v1241_v27, 8.507059e+37 }
0x1a37   :  { %1489 = vpow2.f32 %v1258_v15 }
0x1a3a   :  { %v1488_v18 = vpop.eup %1487 }
0x1a3b   :  { %v1233_v22 = vmul.f32 %v1488_v18, %v1231_v53  ;;  %vm1238_vm9 = vweird.f32 %v1488_v18 }
0x1a3c   :  { %vm1239_vm11 = vmor %vm1237_vm10, %vm1238_vm9 }
0x1a3d   :  { %v1234_v55 = vsub.f32 1.0, %v1233_v22  ;;  %v1490_v44 = vpop.eup %1489 }
0x1a3f   :  { %v1235_v57 = vmul.f32 %v1488_v18, %v1234_v55 }
0x1a41   :  { %v1236_v59 = vadd.f32 %v1488_v18, %v1235_v57 }
0x1a43   :  { %v1240_v61 = vsel %vm1239_vm11, %v1488_v18, %v1236_v59 }
0x1a44   :  { %v1245_v20 = vsel %vm1242_vm12, %v1244_v60, %v1240_v61 }
0x1a45   :  { %v1247_v24 = vmul.f32 1.0614054, %v1245_v20 }
0x1a47   :  { %v1248_v62 = vadd.f32 -1.4531521, %v1247_v24 }
0x1a49   :  { %v1249_v0 = vmul.f32 %v1248_v62, %v1245_v20 }
0x1a4b   :  { %v1250_v1 = vadd.f32 1.4214138, %v1249_v0 }
0x1a4d   :  { %v1251_v16 = vmul.f32 %v1250_v1, %v1245_v20 }
0x1a4f   :  { %v1252_v17 = vadd.f32 -0.28449672, %v1251_v16 }
0x1a51   :  { %v1253_v2 = vmul.f32 %v1252_v17, %v1245_v20 }
0x1a53   :  { %v1254_v3 = vadd.f32 0.2548296, %v1253_v2 }
0x1a55   :  { %v1255_v4 = vmul.f32 %v1254_v3, %v1245_v20 }
0x1a57   :  { %v1260_v5 = vmul.f32 %v1490_v44, %v1255_v4 }
0x1a59   :  { %v1261_v6 = vsub.f32 1.0, %v1260_v5 }
0x1a5b   :  { %v1262_v12 = vmul.f32 %v1261_v6, %v1228_v9 }
0x1a5d   :  { %v1263_v41 = vadd.f32 1.0, %v1262_v12 }
0x1a5f   :  { %v1264_v21 = vmul.f32 %v1263_v41, %v1225_v13 }
0x1a61   :  { %1337 = vmatmul.msk.f32.vlgmr.msra.gmra.mxu1 %vm99_vm2, %v1264_v21 }
0x1ade   :  { %v1291_v26 = vpop.f32.mrf.mxu1 }
0x1adf   :  { %v1292_v37 = vadd.f32 %v1430_v25, %v1291_v26 }
0x1ae1   :  { %1491 = vtanh.f32 %v1292_v37 }
0x1ae7   :  { %v1492_v34 = vpop.eup %1491 }
0x1ae8   :  { %1295 = vst [vmem:[#allocation7] sm:$0x3] %v1492_v34 }
0x1ae9   :  { %1306 = dma.vmem_to_hbm [thread:$0]  %s1302_s6, 32, %s1304_s9, [#allocation4]  }
0x1aea   :  { %1573 = dma.done.wait [#allocation4], 32  }
0x1aeb   :  { %1574 = vsyncadd [#allocation4], 4294967264 }
0x1aec   :  { %1311 = vsyncpa [#allocation3], 1 }
0x1aed   :  { %1312 = vsyncpa [#allocation6], 1 }
0x1aee   :  { %1313 = vsyncpa [#allocation4], 1 }

</bundles_post_ra>
